<compile_context>
chip_gen: v5e
topology: v5e:2x2
jax: 0.10.0
libtpu: 0.0.40
codegen_flags: <defaults>
</compile_context>

<pallas_src>
import jax
import jax.numpy as jnp
from jax.experimental import pallas as pl
from jax.experimental.pallas import tpu as pltpu

LEAKY_SLOPE = 0.01   # nn.LeakyReLU default negative_slope
BN_EPS = 1e-5

# Model dims (DualTaskASPP defaults)
BACKBONE_OUT = 576                       # mobilenet_v3_small features[-1].out_channels
INPUT_DIM = 3
CLS_NUM = 35
ASPP_IN = BACKBONE_OUT + INPUT_DIM       # 579
ASPP_OUT = CLS_NUM + 1                   # 36
DILATE_RATES = (4, 8, 16)
N_BRANCH = len(DILATE_RATES)
BRANCH_CH = 64
FEAT_CH = BRANCH_CH * (N_BRANCH + 1)     # 256  (lane-dense feat slab)
CIN_PAD = 640                            # 579 -> 640 (multiple of 128)
COUT_PAD = 128                           # 36  -> 128 (lane-dense output)


def _round_up(n, m):
    return (n + m - 1) // m * m


def _tap_is_zero(ky, kx, d, h, w):
    """True iff atrous tap (ky,kx) of dilation d (padding=d) reads only zero padding
    for every output position of an (h, w) image."""
    return abs(ky - 1) * d > h - 1 or abs(kx - 1) * d > w - 1


# ----------------------------------------------------------------------------
# Shared tail: feat -> zero-halo slab -> 3x3 projection conv (lane-dense Cout)
# ----------------------------------------------------------------------------
def _project_store(feat, pitch, h, w, featp_ref, wpj_ref, pb_ref, o_ref):
    wsl = w + 2
    # Zero the whole (tiny) slab every grid step: cheaper than 2h+2 masked halo
    # stores and stays correct under "parallel" megacore sharding.
    featp_ref[...] = jnp.zeros_like(featp_ref)
    for yy in range(h):
        dst = (1 + yy) * wsl + 1
        featp_ref[dst:dst + w, :] = feat[yy * pitch:yy * pitch + w, :]
    mout = h * wsl
    out = None
    for t in range(9):
        ky, kx = divmod(t, 3)
        start = ky * wsl + kx
        win = featp_ref[start:start + mout, :]                 # (mout, 256) bf16
        p = jnp.dot(win, wpj_ref[t], preferred_element_type=jnp.float32)
        out = p if out is None else out + p
    o_ref[0] = out + pb_ref[...]


# ----------------------------------------------------------------------------
# Fused-path kernel: every off-center atrous tap is provably zero
# ----------------------------------------------------------------------------
def _make_fused_kernel(h, w):
    hw = h * w
    inv_hw = 1.0 / float(hw)

    def kernel(x_ref, wctr_ref, aff_ref, wpj_ref, pb_ref, o_ref, featp_ref):
        x = x_ref[0]                                            # (hw, CIN_PAD) bf16
        # One MXU pass: lanes [0:192) = 3 branch center taps, [192:256) = SP 1x1.
        y = jnp.dot(x, wctr_ref[...], preferred_element_type=jnp.float32)   # (hw, 256)
        # SPPooling: pool(x)@W == mean over pixels of (x@W); column mean on the XLU.
        colmean = jnp.sum(y, axis=0, keepdims=True) * inv_hw                # (1, 256)
        lane = jax.lax.broadcasted_iota(jnp.int32, (hw, FEAT_CH), 1)
        z = jnp.where(lane < N_BRANCH * BRANCH_CH, y,
                      jnp.broadcast_to(colmean, (hw, FEAT_CH)))
        # fused conv-bias -> LeakyReLU -> folded eval-mode BN
        z = z + aff_ref[0]
        z = jnp.where(z >= 0, z, LEAKY_SLOPE * z)
        feat = (z * aff_ref[1] + aff_ref[2]).astype(jnp.bfloat16)           # (hw, 256)
        _project_store(feat, w, h, w, featp_ref, wpj_ref, pb_ref, o_ref)

    return kernel


# ----------------------------------------------------------------------------
# General-path kernel (larger h,w): in-VMEM padded slab + tap-skipped 9-tap conv
# ----------------------------------------------------------------------------
def _make_general_kernel(h, w, dh):
    hw = h * w
    ws = w + 2 * dh
    mbr = h * ws
    inv_hw = 1.0 / float(hw)

    def kernel(x_ref, wbr_ref, spw_ref, aff_ref, wpj_ref, pb_ref, o_ref,
               xslab_ref, featp_ref):
        x = x_ref[0]                                            # (hw, CIN_PAD) bf16
        # Build the dh-halo zero-padded activation slab in VMEM from the compact
        # input (no inflated padded activation ever goes through HBM).
        xslab_ref[...] = jnp.zeros_like(xslab_ref)
        for yy in range(h):
            dst = (dh + yy) * ws + dh
            xslab_ref[dst:dst + w, :] = x[yy * w:yy * w + w, :]
        parts = []
        for bi, d in enumerate(DILATE_RATES):
            acc = None
            for ky in range(3):
                for kx in range(3):
                    if _tap_is_zero(ky, kx, d, h, w):
                        continue                                 # provably-zero tap
                    start = (dh + (ky - 1) * d) * ws + dh + (kx - 1) * d
                    win = xslab_ref[start:start + mbr, :]        # (mbr, CIN_PAD) bf16
                    p = jnp.dot(win, wbr_ref[bi, ky * 3 + kx],
                                preferred_element_type=jnp.float32)
                    acc = p if acc is None else acc + p
            parts.append(acc)
        # SPPooling from the compact input (real pixels only), f32 accumulation.
        pooled = jnp.sum(x, axis=0, keepdims=True, dtype=jnp.float32) * inv_hw
        sp = jnp.dot(pooled.astype(jnp.bfloat16), spw_ref[...],
                     preferred_element_type=jnp.float32)         # (1, 64)
        parts.append(jnp.broadcast_to(sp, (mbr, BRANCH_CH)))
        z = jnp.concatenate(parts, axis=-1) + aff_ref[0]
        z = jnp.where(z >= 0, z, LEAKY_SLOPE * z)
        feat = (z * aff_ref[1] + aff_ref[2]).astype(jnp.bfloat16)           # (mbr, 256)
        _project_store(feat, ws, h, w, featp_ref, wpj_ref, pb_ref, o_ref)

    return kernel


# ----------------------------------------------------------------------------
# Wrapper: weight packing, BlockSpecs, pallas_call
# ----------------------------------------------------------------------------
def aspp_forward(params, x_cat):
    """ASPP head on NHWC x_cat of shape (B, h, w, ASPP_IN) -> (B, h, w, ASPP_OUT)."""
    B, h, w, cin = x_cat.shape
    hw = h * w
    wsl = w + 2                               # projection slab pitch (+-1 halo)
    mout = h * wsl
    fp_rows = _round_up((h + 2) * wsl + 2, 8)

    # Compact lane-dense activation: (B, h*w, CIN_PAD) bf16 (~20 KB per image).
    x_flat = jnp.pad(x_cat, ((0, 0), (0, 0), (0, 0), (0, CIN_PAD - cin)))
    x_flat = x_flat.reshape(B, hw, CIN_PAD).astype(jnp.bfloat16)

    # Packed per-feat-channel [conv bias ; BN scale ; BN shift] (256 lanes).
    bias = jnp.concatenate([params[f"a{i}_b"] for i in range(N_BRANCH)] + [params["sp_b"]])
    scale = jnp.concatenate([params[f"a{i}_bn_s"] for i in range(N_BRANCH)] + [params["sp_bn_s"]])
    shift = jnp.concatenate([params[f"a{i}_bn_b"] for i in range(N_BRANCH)] + [params["sp_bn_b"]])
    aff = jnp.stack([bias, scale, shift]).reshape(3, 1, FEAT_CH).astype(jnp.float32)

    # Projection conv weights -> (9, 256, 128) bf16 (Cout zero-padded to 128 lanes).
    wpj = jnp.pad(jnp.transpose(params["proj_w"], (2, 3, 1, 0)).reshape(9, FEAT_CH, ASPP_OUT),
                  ((0, 0), (0, 0), (0, COUT_PAD - ASPP_OUT))).astype(jnp.bfloat16)
    pbias = jnp.pad(params["proj_b"],
                    (0, COUT_PAD - ASPP_OUT)).reshape(1, COUT_PAD).astype(jnp.float32)

    common_specs = [
        pl.BlockSpec((3, 1, FEAT_CH), lambda b: (0, 0, 0)),
        pl.BlockSpec((9, FEAT_CH, COUT_PAD), lambda b: (0, 0, 0)),
        pl.BlockSpec((1, COUT_PAD), lambda b: (0, 0)),
    ]
    sp_1x1 = params["sp_w"].reshape(BRANCH_CH, cin).T            # (cin, 64)

    # Every off-center atrous tap is provably zero iff every dilation exceeds the
    # image extent (true at h = w = H//10 for the tested sizes).
    fused = min(DILATE_RATES) > max(h, w) - 1
    if fused:
        # Center taps of the 3 branches + SP 1x1 conv fused into one (640, 256) weight.
        ctr = [params[f"a{i}_w"][:, :, 1, 1].T for i in range(N_BRANCH)]     # (cin, 64)
        wctr = jnp.pad(jnp.concatenate(ctr + [sp_1x1], axis=1),
                       ((0, CIN_PAD - cin), (0, 0))).astype(jnp.bfloat16)    # (640, 256)
        kernel = _make_fused_kernel(h, w)
        operands = (x_flat, wctr, aff, wpj, pbias)
        in_specs = [pl.BlockSpec((1, hw, CIN_PAD), lambda b: (b, 0, 0)),
                    pl.BlockSpec((CIN_PAD, FEAT_CH), lambda b: (0, 0))] + common_specs
        scratch = [pltpu.VMEM((fp_rows, FEAT_CH), jnp.bfloat16)]
    else:
        # General path: dh-halo slab built in VMEM; 9-tap per-branch accumulation
        # with trace-time skipping of provably-zero taps.
        dh = max(d for d in DILATE_RATES if d <= max(h, w) - 1)
        ws = w + 2 * dh
        xs_rows = _round_up((h + 2 * dh) * ws + 2 * dh, 8)
        wbr = jnp.stack([
            jnp.pad(jnp.transpose(params[f"a{i}_w"], (2, 3, 1, 0)).reshape(9, cin, BRANCH_CH),
                    ((0, 0), (0, CIN_PAD - cin), (0, 0)))
            for i in range(N_BRANCH)]).astype(jnp.bfloat16)                  # (3,9,640,64)
        spw = jnp.pad(sp_1x1, ((0, CIN_PAD - cin), (0, 0))).astype(jnp.bfloat16)
        kernel = _make_general_kernel(h, w, dh)
        operands = (x_flat, wbr, spw, aff, wpj, pbias)
        in_specs = [pl.BlockSpec((1, hw, CIN_PAD), lambda b: (b, 0, 0)),
                    pl.BlockSpec((N_BRANCH, 9, CIN_PAD, BRANCH_CH), lambda b: (0, 0, 0, 0)),
                    pl.BlockSpec((CIN_PAD, BRANCH_CH), lambda b: (0, 0))] + common_specs
        scratch = [pltpu.VMEM((xs_rows, CIN_PAD), jnp.bfloat16),
                   pltpu.VMEM((fp_rows, FEAT_CH), jnp.bfloat16)]

    out = pl.pallas_call(
        kernel,
        out_shape=jax.ShapeDtypeStruct((B, mout, COUT_PAD), jnp.float32),
        grid=(B,),
        in_specs=in_specs,
        out_specs=pl.BlockSpec((1, mout, COUT_PAD), lambda b: (b, 0, 0)),
        scratch_shapes=scratch,
        compiler_params=pltpu.CompilerParams(
            dimension_semantics=("parallel",),          # shards batch across v7x's 2 TCs
            vmem_limit_bytes=32 * 1024 * 1024),         # <= v7x 64 MiB; kernel needs ~2 MiB
    )(*operands)

    # Drop the +-1-halo output columns and the Cout lane padding (wrapper glue).
    return out.reshape(B, h, wsl, COUT_PAD)[:, :, :w, :ASPP_OUT]


# ----------------------------------------------------------------------------
# Plain-JAX glue: bilinear resize (F.interpolate semantics), BN folding
# ----------------------------------------------------------------------------
def bilinear_resize_nhwc(x, out_h, out_w):
    """PyTorch F.interpolate(mode='bilinear', align_corners=False) semantics."""
    B, H, W, C = x.shape
    sh, sw = H / out_h, W / out_w
    ys = jnp.clip((jnp.arange(out_h, dtype=jnp.float32) + 0.5) * sh - 0.5, 0.0, H - 1)
    xs = jnp.clip((jnp.arange(out_w, dtype=jnp.float32) + 0.5) * sw - 0.5, 0.0, W - 1)
    y0 = jnp.floor(ys).astype(jnp.int32)
    x0 = jnp.floor(xs).astype(jnp.int32)
    y1 = jnp.minimum(y0 + 1, H - 1)
    x1 = jnp.minimum(x0 + 1, W - 1)
    wy = (ys - y0.astype(jnp.float32))[None, :, None, None]
    wx = (xs - x0.astype(jnp.float32))[None, None, :, None]
    top, bot = x[:, y0, :, :], x[:, y1, :, :]
    row = top * (1.0 - wy) + bot * wy
    left, right = row[:, :, x0, :], row[:, :, x1, :]
    return left * (1.0 - wx) + right * wx


def fold_bn(gamma, beta, running_mean, running_var, eps=BN_EPS):
    s = gamma / jnp.sqrt(running_var + eps)
    return s, beta - running_mean * s


# ----------------------------------------------------------------------------
# Parameters + full forward
# ----------------------------------------------------------------------------
def init_params(key):
    p = {}
    ks = iter(jax.random.split(key, 32))

    def nrm(shape, s=0.05):
        return s * jax.random.normal(next(ks), shape, jnp.float32)

    for i in range(N_BRANCH):
        p[f"a{i}_w"] = nrm((BRANCH_CH, ASPP_IN, 3, 3))
        p[f"a{i}_b"] = nrm((BRANCH_CH,))
        gamma = 1.0 + 0.1 * jax.random.normal(next(ks), (BRANCH_CH,), jnp.float32)
        beta = 0.1 * jax.random.normal(next(ks), (BRANCH_CH,), jnp.float32)
        p[f"a{i}_bn_s"], p[f"a{i}_bn_b"] = fold_bn(
            gamma, beta, jnp.zeros(BRANCH_CH), jnp.ones(BRANCH_CH))

    p["sp_w"] = nrm((BRANCH_CH, ASPP_IN, 1, 1))
    p["sp_b"] = nrm((BRANCH_CH,))
    gamma = 1.0 + 0.1 * jax.random.normal(next(ks), (BRANCH_CH,), jnp.float32)
    beta = 0.1 * jax.random.normal(next(ks), (BRANCH_CH,), jnp.float32)
    p["sp_bn_s"], p["sp_bn_b"] = fold_bn(
        gamma, beta, jnp.zeros(BRANCH_CH), jnp.ones(BRANCH_CH))

    p["proj_w"] = nrm((ASPP_OUT, FEAT_CH, 3, 3))
    p["proj_b"] = nrm((ASPP_OUT,))
    return p


@jax.jit
def dual_task_aspp_forward(params, x_nchw, backbone_feat_nchw):
    """DualTaskASPP.forward. x: (B,3,H,W); backbone_feat: stand-in (B,576,H//10,W//10)."""
    B, _, H, W = x_nchw.shape
    h, w = H // 10, W // 10

    xb = jnp.transpose(backbone_feat_nchw, (0, 2, 3, 1))        # (B, h, w, 576)
    x_nhwc = jnp.transpose(x_nchw, (0, 2, 3, 1))                # (B, H, W, 3)
    xo = bilinear_resize_nhwc(x_nhwc, h, w)                     # TF.resize(x, (h, w))
    x_cat = jnp.concatenate([xb, xo], axis=-1)                  # (B, h, w, 579)

    y = aspp_forward(params, x_cat)                             # (B, h, w, 36)
    y = bilinear_resize_nhwc(y, H, W)                           # (B, H, W, 36)
    y_nchw = jnp.transpose(y, (0, 3, 1, 2))                     # (B, 36, H, W)
    return y_nchw[:, 0:1, :, :], y_nchw[:, 1:, :, :]


# ----------------------------------------------------------------------------
# Pure-XLA f32 reference of the ASPP head (numerical self-check only)
# ----------------------------------------------------------------------------
def _aspp_reference(params, x_cat):
    dn = ("NHWC", "HWIO", "NHWC")
    outs = []
    for i, d in enumerate(DILATE_RATES):
        w_hwio = jnp.transpose(params[f"a{i}_w"], (2, 3, 1, 0))
        y = jax.lax.conv_general_dilated(x_cat, w_hwio, (1, 1), [(d, d), (d, d)],
                                         rhs_dilation=(d, d), dimension_numbers=dn)
        y = y + params[f"a{i}_b"]
        y = jnp.where(y >= 0, y, LEAKY_SLOPE * y)
        outs.append(y * params[f"a{i}_bn_s"] + params[f"a{i}_bn_b"])
    pooled = jnp.mean(x_cat, axis=(1, 2))
    sp = pooled @ params["sp_w"].reshape(BRANCH_CH, -1).T + params["sp_b"]
    sp = jnp.where(sp >= 0, sp, LEAKY_SLOPE * sp)
    sp = sp * params["sp_bn_s"] + params["sp_bn_b"]
    outs.append(jnp.broadcast_to(sp[:, None, None, :], outs[0].shape))
    feat = jnp.concatenate(outs, axis=-1)
    w_hwio = jnp.transpose(params["proj_w"], (2, 3, 1, 0))
    y = jax.lax.conv_general_dilated(feat, w_hwio, (1, 1), [(1, 1), (1, 1)],
                                     dimension_numbers=dn)
    return y + params["proj_b"]


# ----------------------------------------------------------------------------
# Main
# ----------------------------------------------------------------------------
if __name__ == "__main__":
    key = jax.random.PRNGKey(0)
    k_x, k_feat, k_param = jax.random.split(key, 3)

    B, H, W = 2, 40, 40
    x = jax.random.normal(k_x, (B, INPUT_DIM, H, W), jnp.float32)
    # TODO(synk): deterministic stand-in for the pretrained MobileNetV3 backbone
    # features already bilinearly resized to (H//10, W//10).
    backbone_feat = jax.random.normal(
        k_feat, (B, BACKBONE_OUT, H // 10, W // 10), jnp.float32)
    params = init_params(k_param)

    y_reg, y_seg = dual_task_aspp_forward(params, x, backbone_feat)
    y_reg = jax.block_until_ready(y_reg)
    y_seg = jax.block_until_ready(y_seg)

    assert y_reg.shape == (B, 1, H, W), y_reg.shape
    assert y_seg.shape == (B, CLS_NUM, H, W), y_seg.shape
    assert bool(jnp.all(jnp.isfinite(y_reg))) and bool(jnp.all(jnp.isfinite(y_seg)))

    # Numerical self-check of the fused Pallas ASPP against a pure-XLA f32
    # reference (tolerance covers the bf16 MXU operands).
    h, w = H // 10, W // 10
    xb = jnp.transpose(backbone_feat, (0, 2, 3, 1))
    xo = bilinear_resize_nhwc(jnp.transpose(x, (0, 2, 3, 1)), h, w)
    x_cat = jnp.concatenate([xb, xo], axis=-1)
    y_k = jax.block_until_ready(aspp_forward(params, x_cat))
    y_r = _aspp_reference(params, x_cat)
    err = float(jnp.max(jnp.abs(y_k - y_r)))
    ref = float(jnp.max(jnp.abs(y_r)))
    assert err <= 0.05 * ref + 0.3, (err, ref)

    print("KERNEL_OK")
</pallas_src>

<mosaic_0001>
module attributes {stable_mosaic.version = 11 : i64} {
  func.func @kernel(%arg0: i32, %arg1: memref<1x16x640xbf16, #tpu.memory_space<vmem>>, %arg2: memref<640x256xbf16, #tpu.memory_space<vmem>>, %arg3: memref<3x1x256xf32, #tpu.memory_space<vmem>>, %arg4: memref<9x256x128xbf16, #tpu.memory_space<vmem>>, %arg5: memref<1x128xf32, #tpu.memory_space<vmem>>, %arg6: memref<1x24x128xf32, #tpu.memory_space<vmem>>, %arg7: memref<40x256xbf16, #tpu.memory_space<vmem>>) attributes {dimension_semantics = [#tpu.dimension_semantics<parallel>], iteration_bounds = array<i64: 2>, scalar_prefetch = 0 : i64, scratch_operands = 1 : i64, tpu.core_type = #tpu.core_type<tc>, window_params = [{transform_indices = @transform_0, window_bounds = array<i64: 1, 16, 640>}, {pipeline_mode = #tpu.pipeline_mode<synchronous>, transform_indices = @transform_1, window_bounds = array<i64: 640, 256>}, {pipeline_mode = #tpu.pipeline_mode<synchronous>, transform_indices = @transform_2, window_bounds = array<i64: 3, 1, 256>}, {pipeline_mode = #tpu.pipeline_mode<synchronous>, transform_indices = @transform_3, window_bounds = array<i64: 9, 256, 128>}, {pipeline_mode = #tpu.pipeline_mode<synchronous>, transform_indices = @transform_4, window_bounds = array<i64: 1, 128>}, {transform_indices = @transform_5, window_bounds = array<i64: 1, 24, 128>}]} {
    %c0 = arith.constant 0 : index
    %c0_0 = arith.constant 0 : index
    %c0_1 = arith.constant 0 : index
    %0 = vector.load %arg1[%c0, %c0_0, %c0_1] : memref<1x16x640xbf16, #tpu.memory_space<vmem>>, vector<1x16x640xbf16>
    %1 = vector.shape_cast %0 : vector<1x16x640xbf16> to vector<16x640xbf16>
    %c0_2 = arith.constant 0 : index
    %c0_3 = arith.constant 0 : index
    %2 = vector.load %arg2[%c0_2, %c0_3] : memref<640x256xbf16, #tpu.memory_space<vmem>>, vector<640x256xbf16>
    %cst = arith.constant dense<0.000000e+00> : vector<16x256xf32>
    %3 = tpu.matmul %1, %2, %cst {dimension_numbers = #tpu.dot_dimension_numbers<[1], [0], [0], [1], [0, 0, 1, 1], [], []>} : vector<16x640xbf16>, vector<640x256xbf16>, vector<16x256xf32> -> vector<16x256xf32>
    %cst_4 = arith.constant dense<0.000000e+00> : vector<256xf32>
    %4 = vector.multi_reduction <add>, %3, %cst_4 [0] : vector<16x256xf32> to vector<256xf32>
    %5 = vector.shape_cast %4 : vector<256xf32> to vector<1x256xf32>
    %cst_5 = arith.constant 6.250000e-02 : f32
    %6 = vector.broadcast %cst_5 : f32 to vector<1x256xf32>
    %7 = arith.mulf %5, %6 : vector<1x256xf32>
    %8 = tpu.iota {dimensions = array<i32: 1>} : vector<16x256xi32>
    %c192_i32 = arith.constant 192 : i32
    %9 = vector.broadcast %c192_i32 : i32 to vector<16x256xi32>
    %10 = arith.cmpi slt, %8, %9 : vector<16x256xi32>
    %11 = vector.shape_cast %7 : vector<1x256xf32> to vector<1x256xf32>
    %12 = vector.broadcast %11 : vector<1x256xf32> to vector<16x256xf32>
    %13 = arith.select %10, %3, %12 : vector<16x256xi1>, vector<16x256xf32>
    %c0_6 = arith.constant 0 : index
    %c0_7 = arith.constant 0 : index
    %c0_8 = arith.constant 0 : index
    %14 = vector.load %arg3[%c0_6, %c0_7, %c0_8] : memref<3x1x256xf32, #tpu.memory_space<vmem>>, vector<1x1x256xf32>
    %15 = vector.shape_cast %14 : vector<1x1x256xf32> to vector<1x256xf32>
    %16 = vector.broadcast %15 : vector<1x256xf32> to vector<16x256xf32>
    %17 = arith.addf %13, %16 : vector<16x256xf32>
    %cst_9 = arith.constant 0.000000e+00 : f32
    %18 = vector.broadcast %cst_9 : f32 to vector<16x256xf32>
    %19 = arith.cmpf oge, %17, %18 : vector<16x256xf32>
    %cst_10 = arith.constant 0.00999999977 : f32
    %20 = vector.broadcast %cst_10 : f32 to vector<16x256xf32>
    %21 = arith.mulf %20, %17 : vector<16x256xf32>
    %22 = arith.select %19, %17, %21 : vector<16x256xi1>, vector<16x256xf32>
    %c1 = arith.constant 1 : index
    %c0_11 = arith.constant 0 : index
    %c0_12 = arith.constant 0 : index
    %23 = vector.load %arg3[%c1, %c0_11, %c0_12] : memref<3x1x256xf32, #tpu.memory_space<vmem>>, vector<1x1x256xf32>
    %24 = vector.shape_cast %23 : vector<1x1x256xf32> to vector<1x256xf32>
    %25 = vector.broadcast %24 : vector<1x256xf32> to vector<16x256xf32>
    %26 = arith.mulf %22, %25 : vector<16x256xf32>
    %c2 = arith.constant 2 : index
    %c0_13 = arith.constant 0 : index
    %c0_14 = arith.constant 0 : index
    %27 = vector.load %arg3[%c2, %c0_13, %c0_14] : memref<3x1x256xf32, #tpu.memory_space<vmem>>, vector<1x1x256xf32>
    %28 = vector.shape_cast %27 : vector<1x1x256xf32> to vector<1x256xf32>
    %29 = vector.broadcast %28 : vector<1x256xf32> to vector<16x256xf32>
    %30 = arith.addf %26, %29 : vector<16x256xf32>
    %31 = arith.truncf %30 : vector<16x256xf32> to vector<16x256xbf16>
    %cst_15 = arith.constant 0.000000e+00 : bf16
    %32 = vector.broadcast %cst_15 : bf16 to vector<40x256xbf16>
    %c0_16 = arith.constant 0 : index
    %c0_17 = arith.constant 0 : index
    %33 = vector.load %arg7[%c0_16, %c0_17] : memref<40x256xbf16, #tpu.memory_space<vmem>>, vector<40x256xbf16>
    tpu.vector_store %arg7[%c0_16, %c0_17], %32 {strides = array<i32>} : memref<40x256xbf16, #tpu.memory_space<vmem>>, vector<40x256xbf16>,
    %34 = vector.extract_strided_slice %31 {offsets = [0, 0], sizes = [4, 256], strides = [1, 1]} : vector<16x256xbf16> to vector<4x256xbf16>
    %c7 = arith.constant 7 : index
    %c0_18 = arith.constant 0 : index
    %35 = vector.load %arg7[%c7, %c0_18] : memref<40x256xbf16, #tpu.memory_space<vmem>>, vector<4x256xbf16>
    tpu.vector_store %arg7[%c7, %c0_18], %34 {strides = array<i32>} : memref<40x256xbf16, #tpu.memory_space<vmem>>, vector<4x256xbf16>,
    %36 = vector.extract_strided_slice %31 {offsets = [4, 0], sizes = [4, 256], strides = [1, 1]} : vector<16x256xbf16> to vector<4x256xbf16>
    %c13 = arith.constant 13 : index
    %c0_19 = arith.constant 0 : index
    %37 = vector.load %arg7[%c13, %c0_19] : memref<40x256xbf16, #tpu.memory_space<vmem>>, vector<4x256xbf16>
    tpu.vector_store %arg7[%c13, %c0_19], %36 {strides = array<i32>} : memref<40x256xbf16, #tpu.memory_space<vmem>>, vector<4x256xbf16>,
    %38 = vector.extract_strided_slice %31 {offsets = [8, 0], sizes = [4, 256], strides = [1, 1]} : vector<16x256xbf16> to vector<4x256xbf16>
    %c19 = arith.constant 19 : index
    %c0_20 = arith.constant 0 : index
    %39 = vector.load %arg7[%c19, %c0_20] : memref<40x256xbf16, #tpu.memory_space<vmem>>, vector<4x256xbf16>
    tpu.vector_store %arg7[%c19, %c0_20], %38 {strides = array<i32>} : memref<40x256xbf16, #tpu.memory_space<vmem>>, vector<4x256xbf16>,
    %40 = vector.extract_strided_slice %31 {offsets = [12, 0], sizes = [4, 256], strides = [1, 1]} : vector<16x256xbf16> to vector<4x256xbf16>
    %c25 = arith.constant 25 : index
    %c0_21 = arith.constant 0 : index
    %41 = vector.load %arg7[%c25, %c0_21] : memref<40x256xbf16, #tpu.memory_space<vmem>>, vector<4x256xbf16>
    tpu.vector_store %arg7[%c25, %c0_21], %40 {strides = array<i32>} : memref<40x256xbf16, #tpu.memory_space<vmem>>, vector<4x256xbf16>,
    %c0_22 = arith.constant 0 : index
    %c0_23 = arith.constant 0 : index
    %42 = vector.load %arg7[%c0_22, %c0_23] : memref<40x256xbf16, #tpu.memory_space<vmem>>, vector<24x256xbf16>
    %c0_24 = arith.constant 0 : index
    %c0_25 = arith.constant 0 : index
    %c0_26 = arith.constant 0 : index
    %43 = vector.load %arg4[%c0_24, %c0_25, %c0_26] : memref<9x256x128xbf16, #tpu.memory_space<vmem>>, vector<1x256x128xbf16>
    %44 = vector.shape_cast %43 : vector<1x256x128xbf16> to vector<256x128xbf16>
    %cst_27 = arith.constant dense<0.000000e+00> : vector<24x128xf32>
    %45 = tpu.matmul %42, %44, %cst_27 {dimension_numbers = #tpu.dot_dimension_numbers<[1], [0], [0], [1], [0, 0, 1, 1], [], []>} : vector<24x256xbf16>, vector<256x128xbf16>, vector<24x128xf32> -> vector<24x128xf32>
    %c1_28 = arith.constant 1 : index
    %c0_29 = arith.constant 0 : index
    %46 = vector.load %arg7[%c1_28, %c0_29] : memref<40x256xbf16, #tpu.memory_space<vmem>>, vector<24x256xbf16>
    %c1_30 = arith.constant 1 : index
    %c0_31 = arith.constant 0 : index
    %c0_32 = arith.constant 0 : index
    %47 = vector.load %arg4[%c1_30, %c0_31, %c0_32] : memref<9x256x128xbf16, #tpu.memory_space<vmem>>, vector<1x256x128xbf16>
    %48 = vector.shape_cast %47 : vector<1x256x128xbf16> to vector<256x128xbf16>
    %cst_33 = arith.constant dense<0.000000e+00> : vector<24x128xf32>
    %49 = tpu.matmul %46, %48, %cst_33 {dimension_numbers = #tpu.dot_dimension_numbers<[1], [0], [0], [1], [0, 0, 1, 1], [], []>} : vector<24x256xbf16>, vector<256x128xbf16>, vector<24x128xf32> -> vector<24x128xf32>
    %50 = arith.addf %45, %49 : vector<24x128xf32>
    %c2_34 = arith.constant 2 : index
    %c0_35 = arith.constant 0 : index
    %51 = vector.load %arg7[%c2_34, %c0_35] : memref<40x256xbf16, #tpu.memory_space<vmem>>, vector<24x256xbf16>
    %c2_36 = arith.constant 2 : index
    %c0_37 = arith.constant 0 : index
    %c0_38 = arith.constant 0 : index
    %52 = vector.load %arg4[%c2_36, %c0_37, %c0_38] : memref<9x256x128xbf16, #tpu.memory_space<vmem>>, vector<1x256x128xbf16>
    %53 = vector.shape_cast %52 : vector<1x256x128xbf16> to vector<256x128xbf16>
    %cst_39 = arith.constant dense<0.000000e+00> : vector<24x128xf32>
    %54 = tpu.matmul %51, %53, %cst_39 {dimension_numbers = #tpu.dot_dimension_numbers<[1], [0], [0], [1], [0, 0, 1, 1], [], []>} : vector<24x256xbf16>, vector<256x128xbf16>, vector<24x128xf32> -> vector<24x128xf32>
    %55 = arith.addf %50, %54 : vector<24x128xf32>
    %c6 = arith.constant 6 : index
    %c0_40 = arith.constant 0 : index
    %56 = vector.load %arg7[%c6, %c0_40] : memref<40x256xbf16, #tpu.memory_space<vmem>>, vector<24x256xbf16>
    %c3 = arith.constant 3 : index
    %c0_41 = arith.constant 0 : index
    %c0_42 = arith.constant 0 : index
    %57 = vector.load %arg4[%c3, %c0_41, %c0_42] : memref<9x256x128xbf16, #tpu.memory_space<vmem>>, vector<1x256x128xbf16>
    %58 = vector.shape_cast %57 : vector<1x256x128xbf16> to vector<256x128xbf16>
    %cst_43 = arith.constant dense<0.000000e+00> : vector<24x128xf32>
    %59 = tpu.matmul %56, %58, %cst_43 {dimension_numbers = #tpu.dot_dimension_numbers<[1], [0], [0], [1], [0, 0, 1, 1], [], []>} : vector<24x256xbf16>, vector<256x128xbf16>, vector<24x128xf32> -> vector<24x128xf32>
    %60 = arith.addf %55, %59 : vector<24x128xf32>
    %c7_44 = arith.constant 7 : index
    %c0_45 = arith.constant 0 : index
    %61 = vector.load %arg7[%c7_44, %c0_45] : memref<40x256xbf16, #tpu.memory_space<vmem>>, vector<24x256xbf16>
    %c4 = arith.constant 4 : index
    %c0_46 = arith.constant 0 : index
    %c0_47 = arith.constant 0 : index
    %62 = vector.load %arg4[%c4, %c0_46, %c0_47] : memref<9x256x128xbf16, #tpu.memory_space<vmem>>, vector<1x256x128xbf16>
    %63 = vector.shape_cast %62 : vector<1x256x128xbf16> to vector<256x128xbf16>
    %cst_48 = arith.constant dense<0.000000e+00> : vector<24x128xf32>
    %64 = tpu.matmul %61, %63, %cst_48 {dimension_numbers = #tpu.dot_dimension_numbers<[1], [0], [0], [1], [0, 0, 1, 1], [], []>} : vector<24x256xbf16>, vector<256x128xbf16>, vector<24x128xf32> -> vector<24x128xf32>
    %65 = arith.addf %60, %64 : vector<24x128xf32>
    %c8 = arith.constant 8 : index
    %c0_49 = arith.constant 0 : index
    %66 = vector.load %arg7[%c8, %c0_49] : memref<40x256xbf16, #tpu.memory_space<vmem>>, vector<24x256xbf16>
    %c5 = arith.constant 5 : index
    %c0_50 = arith.constant 0 : index
    %c0_51 = arith.constant 0 : index
    %67 = vector.load %arg4[%c5, %c0_50, %c0_51] : memref<9x256x128xbf16, #tpu.memory_space<vmem>>, vector<1x256x128xbf16>
    %68 = vector.shape_cast %67 : vector<1x256x128xbf16> to vector<256x128xbf16>
    %cst_52 = arith.constant dense<0.000000e+00> : vector<24x128xf32>
    %69 = tpu.matmul %66, %68, %cst_52 {dimension_numbers = #tpu.dot_dimension_numbers<[1], [0], [0], [1], [0, 0, 1, 1], [], []>} : vector<24x256xbf16>, vector<256x128xbf16>, vector<24x128xf32> -> vector<24x128xf32>
    %70 = arith.addf %65, %69 : vector<24x128xf32>
    %c12 = arith.constant 12 : index
    %c0_53 = arith.constant 0 : index
    %71 = vector.load %arg7[%c12, %c0_53] : memref<40x256xbf16, #tpu.memory_space<vmem>>, vector<24x256xbf16>
    %c6_54 = arith.constant 6 : index
    %c0_55 = arith.constant 0 : index
    %c0_56 = arith.constant 0 : index
    %72 = vector.load %arg4[%c6_54, %c0_55, %c0_56] : memref<9x256x128xbf16, #tpu.memory_space<vmem>>, vector<1x256x128xbf16>
    %73 = vector.shape_cast %72 : vector<1x256x128xbf16> to vector<256x128xbf16>
    %cst_57 = arith.constant dense<0.000000e+00> : vector<24x128xf32>
    %74 = tpu.matmul %71, %73, %cst_57 {dimension_numbers = #tpu.dot_dimension_numbers<[1], [0], [0], [1], [0, 0, 1, 1], [], []>} : vector<24x256xbf16>, vector<256x128xbf16>, vector<24x128xf32> -> vector<24x128xf32>
    %75 = arith.addf %70, %74 : vector<24x128xf32>
    %c13_58 = arith.constant 13 : index
    %c0_59 = arith.constant 0 : index
    %76 = vector.load %arg7[%c13_58, %c0_59] : memref<40x256xbf16, #tpu.memory_space<vmem>>, vector<24x256xbf16>
    %c7_60 = arith.constant 7 : index
    %c0_61 = arith.constant 0 : index
    %c0_62 = arith.constant 0 : index
    %77 = vector.load %arg4[%c7_60, %c0_61, %c0_62] : memref<9x256x128xbf16, #tpu.memory_space<vmem>>, vector<1x256x128xbf16>
    %78 = vector.shape_cast %77 : vector<1x256x128xbf16> to vector<256x128xbf16>
    %cst_63 = arith.constant dense<0.000000e+00> : vector<24x128xf32>
    %79 = tpu.matmul %76, %78, %cst_63 {dimension_numbers = #tpu.dot_dimension_numbers<[1], [0], [0], [1], [0, 0, 1, 1], [], []>} : vector<24x256xbf16>, vector<256x128xbf16>, vector<24x128xf32> -> vector<24x128xf32>
    %80 = arith.addf %75, %79 : vector<24x128xf32>
    %c14 = arith.constant 14 : index
    %c0_64 = arith.constant 0 : index
    %81 = vector.load %arg7[%c14, %c0_64] : memref<40x256xbf16, #tpu.memory_space<vmem>>, vector<24x256xbf16>
    %c8_65 = arith.constant 8 : index
    %c0_66 = arith.constant 0 : index
    %c0_67 = arith.constant 0 : index
    %82 = vector.load %arg4[%c8_65, %c0_66, %c0_67] : memref<9x256x128xbf16, #tpu.memory_space<vmem>>, vector<1x256x128xbf16>
    %83 = vector.shape_cast %82 : vector<1x256x128xbf16> to vector<256x128xbf16>
    %cst_68 = arith.constant dense<0.000000e+00> : vector<24x128xf32>
    %84 = tpu.matmul %81, %83, %cst_68 {dimension_numbers = #tpu.dot_dimension_numbers<[1], [0], [0], [1], [0, 0, 1, 1], [], []>} : vector<24x256xbf16>, vector<256x128xbf16>, vector<24x128xf32> -> vector<24x128xf32>
    %85 = arith.addf %80, %84 : vector<24x128xf32>
    %c0_69 = arith.constant 0 : index
    %c0_70 = arith.constant 0 : index
    %86 = vector.load %arg5[%c0_69, %c0_70] : memref<1x128xf32, #tpu.memory_space<vmem>>, vector<1x128xf32>
    %87 = vector.broadcast %86 : vector<1x128xf32> to vector<24x128xf32>
    %88 = arith.addf %85, %87 : vector<24x128xf32>
    %c0_71 = arith.constant 0 : index
    %c0_72 = arith.constant 0 : index
    %c0_73 = arith.constant 0 : index
    %89 = vector.load %arg6[%c0_71, %c0_72, %c0_73] : memref<1x24x128xf32, #tpu.memory_space<vmem>>, vector<1x24x128xf32>
    %90 = vector.shape_cast %89 : vector<1x24x128xf32> to vector<24x128xf32>
    %91 = vector.shape_cast %88 : vector<24x128xf32> to vector<1x24x128xf32>
    tpu.vector_store %arg6[%c0_71, %c0_72, %c0_73], %91 {strides = array<i32>} : memref<1x24x128xf32, #tpu.memory_space<vmem>>, vector<1x24x128xf32>,
    return
  }
  func.func @transform_0(%arg0: i32) -> (i32, i32, i32) {
    %c0_i32 = arith.constant 0 : i32
    %c0_i32_0 = arith.constant 0 : i32
    %c0_i32_1 = arith.constant 0 : i32
    return %arg0, %c0_i32, %c0_i32_0 : i32, i32, i32
  }
  func.func @transform_1(%arg0: i32) -> (i32, i32) {
    %c0_i32 = arith.constant 0 : i32
    %c0_i32_0 = arith.constant 0 : i32
    %c0_i32_1 = arith.constant 0 : i32
    return %c0_i32, %c0_i32_0 : i32, i32
  }
  func.func @transform_2(%arg0: i32) -> (i32, i32, i32) {
    %c0_i32 = arith.constant 0 : i32
    %c0_i32_0 = arith.constant 0 : i32
    %c0_i32_1 = arith.constant 0 : i32
    %c0_i32_2 = arith.constant 0 : i32
    return %c0_i32, %c0_i32_0, %c0_i32_1 : i32, i32, i32
  }
  func.func @transform_3(%arg0: i32) -> (i32, i32, i32) {
    %c0_i32 = arith.constant 0 : i32
    %c0_i32_0 = arith.constant 0 : i32
    %c0_i32_1 = arith.constant 0 : i32
    %c0_i32_2 = arith.constant 0 : i32
    return %c0_i32, %c0_i32_0, %c0_i32_1 : i32, i32, i32
  }
  func.func @transform_4(%arg0: i32) -> (i32, i32) {
    %c0_i32 = arith.constant 0 : i32
    %c0_i32_0 = arith.constant 0 : i32
    %c0_i32_1 = arith.constant 0 : i32
    return %c0_i32, %c0_i32_0 : i32, i32
  }
  func.func @transform_5(%arg0: i32) -> (i32, i32, i32) {
    %c0_i32 = arith.constant 0 : i32
    %c0_i32_0 = arith.constant 0 : i32
    %c0_i32_1 = arith.constant 0 : i32
    return %arg0, %c0_i32, %c0_i32_0 : i32, i32, i32
  }
}

</mosaic_0001>

<bundles_post_ra>
// kernel: dual_task_aspp_forward.1
= control target key start
LH: loop header
LB: loop body
LE: loop exit
PB: predicated region body
PF: predicated region fallthrough
CT: control target
= control target key end

     0   :  { %s4321_s18 = smov 0   ;;  %s5566_s0 = inlined_call_operand.vmem [shape: bf16[2,16,640], index: 0, kind: input, shape index: {}]   ;;  %s5567_s1 = inlined_call_operand.vmem [shape: bf16[640,256], index: 1, kind: input, shape index: {}]   ;;  %s5568_s2 = inlined_call_operand.vmem [shape: f32[3,1,256], index: 2, kind: input, shape index: {}]   ;;  %s5569_s3 = inlined_call_operand.vmem [shape: bf16[9,256,128], index: 3, kind: input, shape index: {}]   ;;  %s5570_s4 = inlined_call_operand.vmem [shape: f32[1,128], index: 4, kind: input, shape index: {}]   ;;  %s5571_s5 = inlined_call_operand.vmem [shape: f32[2,24,128], index: 5, kind: output, shape index: {}]  }
   0x1 LB: > { %s2858_s19 = sadd.s32 4294967295, %s4288_s18   ;;  %p2862_p0 = scmp.ge.s32.totalorder %s4288_s18, 1  ;;  %s4288_s18 = sphi %s4321_s18, %s15_s18  }
   0x2   : > { %p187_p1 = scmp.lt.s32.totalorder %s4288_s18, 3 }
   0x4   : > { %p188_p2 = pnand %p2862_p0, %p187_p1 }
   0x5   : > { %p215_p3 = scmp.lt.s32.totalorder (!%p188_p2), %s2858_s19, 1 }
   0x6   : > { %191 = sbr.rel (%p188_p2) target bundleno = 587 (0x24b), region = 40 }
   0xb   : > { %v2943_v0 = vld [vmem:[%s5567_s1 + $0x70] sm:$0xf]  ;;  %v4061_v1 = vld [vmem:[%s5567_s1 + $0x74] sm:$0xf0]  ;;  %v2935_v11 = vld [vmem:[%s5567_s1 + $0x60] sm:$0xf] }
   0xc   : > { %v3007_v2 = vld [vmem:[%s5567_s1 + $0xf0] sm:$0xf]  ;;  %v2944_v3 = vor.u32 %v4061_v1, %v2943_v0  ;;  %v4077_v4 = vld [vmem:[%s5567_s1 + $0xf4] sm:$0xf0]  ;;  %v4059_v13 = vld [vmem:[%s5567_s1 + $0x64] sm:$0xf0] }
   0xd   : > { %v3071_v5 = vld [vmem:[%s5567_s1 + $0x170] sm:$0xf]  ;;  %v4093_v6 = vld [vmem:[%s5567_s1 + $0x174] sm:$0xf0]  ;;  %v3008_v7 = vor.u32 %v4077_v4, %v3007_v2  ;;  %v2999_v14 = vld [vmem:[%s5567_s1 + $0xe0] sm:$0xf]  ;;  %v2936_v16 = vor.u32 %v4059_v13, %v2935_v11 }
   0xe   : > { %v3072_v8 = vor.u32 %v4093_v6, %v3071_v5  ;;  %v3135_v9 = vld [vmem:[%s5567_s1 + $0x1f0] sm:$0xf]  ;;  %v4109_v10 = vld [vmem:[%s5567_s1 + $0x1f4] sm:$0xf0]  ;;  %738 = vmatpush.bf16.msra.mxu0 %v2944_v3  ;;  %v4075_v15 = vld [vmem:[%s5567_s1 + $0xe4] sm:$0xf0] }
   0xf   : > { %v3136_v12 = vor.u32 %v4109_v10, %v3135_v9  ;;  %752 = vmatpush.bf16.msra.mxu1 %v3008_v7  ;;  %v3000_v17 = vor.u32 %v4075_v15, %v2999_v14  ;;  %v3063_v18 = vld [vmem:[%s5567_s1 + $0x160] sm:$0xf]  ;;  %v4091_v19 = vld [vmem:[%s5567_s1 + $0x164] sm:$0xf0]  ;;  %v2927_v23 = vld [vmem:[%s5567_s1 + $0x50] sm:$0xf] }
  0x10   : > { %766 = vmatpush.bf16.msra.mxu2 %v3072_v8  ;;  %v3127_v20 = vld [vmem:[%s5567_s1 + $0x1e0] sm:$0xf]  ;;  %v3064_v21 = vor.u32 %v4091_v19, %v3063_v18  ;;  %v4107_v22 = vld [vmem:[%s5567_s1 + $0x1e4] sm:$0xf0]  ;;  %v4057_v24 = vld [vmem:[%s5567_s1 + $0x54] sm:$0xf0] }
  0x11   : > { %780 = vmatpush.bf16.msra.mxu3 %v3136_v12  ;;  %v3128_v25 = vor.u32 %v4107_v22, %v3127_v20  ;;  %v2991_v26 = vld [vmem:[%s5567_s1 + $0xd0] sm:$0xf]  ;;  %v4073_v27 = vld [vmem:[%s5567_s1 + $0xd4] sm:$0xf0]  ;;  %v2928_v29 = vor.u32 %v4057_v24, %v2927_v23  ;;  %v2919_v35 = vld [vmem:[%s5567_s1 + $0x40] sm:$0xf] }
  0x12   : > { %v3055_v28 = vld [vmem:[%s5567_s1 + $0x150] sm:$0xf]  ;;  %739 = vmatpush.bf16.msra.mxu0 %v2936_v16  ;;  %v4089_v30 = vld [vmem:[%s5567_s1 + $0x154] sm:$0xf0]  ;;  %v2992_v33 = vor.u32 %v4073_v27, %v2991_v26  ;;  %v4055_v36 = vld [vmem:[%s5567_s1 + $0x44] sm:$0xf0] }
  0x13   : > { %v3119_v31 = vld [vmem:[%s5567_s1 + $0x1d0] sm:$0xf]  ;;  %v4105_v32 = vld [vmem:[%s5567_s1 + $0x1d4] sm:$0xf0]  ;;  %753 = vmatpush.bf16.msra.mxu1 %v3000_v17  ;;  %v3056_v34 = vor.u32 %v4089_v30, %v3055_v28  ;;  %v2983_v37 = vld [vmem:[%s5567_s1 + $0xc0] sm:$0xf]  ;;  %v2920_v44 = vor.u32 %v4055_v36, %v2919_v35 }
  0x14   : > { %767 = vmatpush.bf16.msra.mxu2 %v3064_v21  ;;  %v3120_v38 = vor.u32 %v4105_v32, %v3119_v31  ;;  %v4071_v39 = vld [vmem:[%s5567_s1 + $0xc4] sm:$0xf0]  ;;  %v3047_v40 = vld [vmem:[%s5567_s1 + $0x140] sm:$0xf]  ;;  %v2911_v47 = vld [vmem:[%s5567_s1 + $0x30] sm:$0xf] }
  0x15   : > { %781 = vmatpush.bf16.msra.mxu3 %v3128_v25  ;;  %v4087_v41 = vld [vmem:[%s5567_s1 + $0x144] sm:$0xf0]  ;;  %v3111_v42 = vld [vmem:[%s5567_s1 + $0x1c0] sm:$0xf]  ;;  %v2984_v45 = vor.u32 %v4071_v39, %v2983_v37  ;;  %v4053_v48 = vld [vmem:[%s5567_s1 + $0x34] sm:$0xf0] }
  0x16   : > { %v4103_v43 = vld [vmem:[%s5567_s1 + $0x1c4] sm:$0xf0]  ;;  %740 = vmatpush.bf16.msra.mxu0 %v2928_v29  ;;  %v3048_v46 = vor.u32 %v4087_v41, %v3047_v40  ;;  %v2975_v49 = vld [vmem:[%s5567_s1 + $0xb0] sm:$0xf]  ;;  %v4069_v51 = vld [vmem:[%s5567_s1 + $0xb4] sm:$0xf0]  ;;  %v2912_v56 = vor.u32 %v4053_v48, %v2911_v47 }
  0x17   : > { %754 = vmatpush.bf16.msra.mxu1 %v2992_v33  ;;  %v3112_v50 = vor.u32 %v4103_v43, %v3111_v42  ;;  %v3039_v52 = vld [vmem:[%s5567_s1 + $0x130] sm:$0xf]  ;;  %v4085_v53 = vld [vmem:[%s5567_s1 + $0x134] sm:$0xf0]  ;;  %v2976_v57 = vor.u32 %v4069_v51, %v2975_v49  ;;  %v2903_v59 = vld [vmem:[%s5567_s1 + $0x20] sm:$0xf] }
  0x18   : > { %768 = vmatpush.bf16.msra.mxu2 %v3056_v34  ;;  %v3103_v54 = vld [vmem:[%s5567_s1 + $0x1b0] sm:$0xf]  ;;  %v4101_v55 = vld [vmem:[%s5567_s1 + $0x1b4] sm:$0xf0]  ;;  %v3040_v58 = vor.u32 %v4085_v53, %v3039_v52  ;;  %v4051_v60 = vld [vmem:[%s5567_s1 + $0x24] sm:$0xf0] }
  0x19   : > { %782 = vmatpush.bf16.msra.mxu3 %v3120_v38  ;;  %v2967_v61 = vld [vmem:[%s5567_s1 + $0xa0] sm:$0xf]  ;;  %v3104_v62 = vor.u32 %v4101_v55, %v3103_v54  ;;  %v4067_v63 = vld [vmem:[%s5567_s1 + $0xa4] sm:$0xf0]  ;;  %v2904_v4 = vor.u32 %v4051_v60, %v2903_v59  ;;  %v2895_v7 = vld [vmem:[%s5567_s1 + $0x10] sm:$0xf] }
  0x1a   : > { %741 = vmatpush.bf16.msra.mxu0 %v2920_v44  ;;  %v3031_v0 = vld [vmem:[%s5567_s1 + $0x120] sm:$0xf]  ;;  %v4083_v1 = vld [vmem:[%s5567_s1 + $0x124] sm:$0xf0]  ;;  %v2968_v5 = vor.u32 %v4067_v63, %v2967_v61  ;;  %v4049_v8 = vld [vmem:[%s5567_s1 + $0x14] sm:$0xf0] }
  0x1b   : > { %755 = vmatpush.bf16.msra.mxu1 %v2984_v45  ;;  %v3095_v2 = vld [vmem:[%s5567_s1 + $0x1a0] sm:$0xf]  ;;  %v4099_v3 = vld [vmem:[%s5567_s1 + $0x1a4] sm:$0xf0]  ;;  %v3032_v6 = vor.u32 %v4083_v1, %v3031_v0  ;;  %v2959_v9 = vld [vmem:[%s5567_s1 + $0x90] sm:$0xf]  ;;  %v2896_v16 = vor.u32 %v4049_v8, %v2895_v7 }
  0x1c   : > { %769 = vmatpush.bf16.msra.mxu2 %v3048_v46  ;;  %v3096_v10 = vor.u32 %v4099_v3, %v3095_v2  ;;  %v4065_v11 = vld [vmem:[%s5567_s1 + $0x94] sm:$0xf0]  ;;  %v3023_v12 = vld [vmem:[%s5567_s1 + $0x110] sm:$0xf]  ;;  %v2887_v17 = vld [vmem:[%s5567_s1] sm:$0xf] }
  0x1d   : > { %783 = vmatpush.bf16.msra.mxu3 %v3112_v50  ;;  %v4081_v13 = vld [vmem:[%s5567_s1 + $0x114] sm:$0xf0]  ;;  %v3087_v14 = vld [vmem:[%s5567_s1 + $0x190] sm:$0xf]  ;;  %v4047_v18 = vld [vmem:[%s5567_s1 + $0x4] sm:$0xf0]  ;;  %v2960_v19 = vor.u32 %v4065_v11, %v2959_v9 }
  0x1e   : > { %742 = vmatpush.bf16.msra.mxu0 %v2912_v56  ;;  %v4097_v15 = vld [vmem:[%s5567_s1 + $0x194] sm:$0xf0]  ;;  %v3024_v20 = vor.u32 %v4081_v13, %v3023_v12  ;;  %v2951_v21 = vld [vmem:[%s5567_s1 + $0x80] sm:$0xf]  ;;  %v4063_v22 = vld [vmem:[%s5567_s1 + $0x84] sm:$0xf0]  ;;  %v2888_v31 = vor.u32 %v4047_v18, %v2887_v17 }
  0x1f   : > { %756 = vmatpush.bf16.msra.mxu1 %v2976_v57  ;;  %v3015_v23 = vld [vmem:[%s5567_s1 + $0x100] sm:$0xf]  ;;  %v3088_v24 = vor.u32 %v4097_v15, %v3087_v14  ;;  %v4079_v25 = vld [vmem:[%s5567_s1 + $0x104] sm:$0xf0]  ;;  %v3199_v26 = vld [vmem:[%s5567_s1 + $0x270] sm:$0xf]  ;;  %v2952_v35 = vor.u32 %v4063_v22, %v2951_v21 }
  0x20   : > { %770 = vmatpush.bf16.msra.mxu2 %v3040_v58  ;;  %v4125_v27 = vld [vmem:[%s5567_s1 + $0x274] sm:$0xf0]  ;;  %v4060_v28 = vld [vmem:[%s5567_s1 + $0x74] sm:$0xf]  ;;  %v2945_v29 = vld [vmem:[%s5567_s1 + $0x78] sm:$0xf0]  ;;  %v3016_v36 = vor.u32 %v4079_v25, %v3015_v23 }
  0x21   : > { %784 = vmatpush.bf16.msra.mxu3 %v3104_v62  ;;  %v4076_v30 = vld [vmem:[%s5567_s1 + $0xf4] sm:$0xf]  ;;  %v3009_v32 = vld [vmem:[%s5567_s1 + $0xf8] sm:$0xf0]  ;;  %v3079_v33 = vld [vmem:[%s5567_s1 + $0x180] sm:$0xf]  ;;  %v3200_v39 = vor.u32 %v4125_v27, %v3199_v26  ;;  %v2948_v40 = vor.u32 %v4060_v28, %v2945_v29 }
  0x22   : > { %743 = vmatpush.bf16.msra.mxu0 %v2904_v4  ;;  %v4095_v34 = vld [vmem:[%s5567_s1 + $0x184] sm:$0xf0]  ;;  %v4092_v37 = vld [vmem:[%s5567_s1 + $0x174] sm:$0xf]  ;;  %v3073_v38 = vld [vmem:[%s5567_s1 + $0x178] sm:$0xf0]  ;;  %v3012_v42 = vor.u32 %v4076_v30, %v3009_v32 }
  0x23   : > { %757 = vmatpush.bf16.msra.mxu1 %v2968_v5  ;;  %v3191_v41 = vld [vmem:[%s5567_s1 + $0x260] sm:$0xf]  ;;  %v3080_v43 = vor.u32 %v4095_v34, %v3079_v33  ;;  %v4123_v44 = vld [vmem:[%s5567_s1 + $0x264] sm:$0xf0]  ;;  %v4058_v45 = vld [vmem:[%s5567_s1 + $0x64] sm:$0xf]  ;;  %v3076_v47 = vor.u32 %v4092_v37, %v3073_v38 }
  0x24   : > { %771 = vmatpush.bf16.msra.mxu2 %v3032_v6  ;;  %v2937_v46 = vld [vmem:[%s5567_s1 + $0x68] sm:$0xf0]  ;;  %v4074_v48 = vld [vmem:[%s5567_s1 + $0xe4] sm:$0xf]  ;;  %v3183_v52 = vld [vmem:[%s5567_s1 + $0x250] sm:$0xf]  ;;  %v3192_v53 = vor.u32 %v4123_v44, %v3191_v41 }
  0x25   : > { %785 = vmatpush.bf16.msra.mxu3 %v3096_v10  ;;  %v3001_v49 = vld [vmem:[%s5567_s1 + $0xe8] sm:$0xf0]  ;;  %v4090_v50 = vld [vmem:[%s5567_s1 + $0x164] sm:$0xf]  ;;  %v2940_v54 = vor.u32 %v4058_v45, %v2937_v46  ;;  %v4121_v55 = vld [vmem:[%s5567_s1 + $0x254] sm:$0xf0] }
  0x26   : > { %744 = vmatpush.bf16.msra.mxu0 %v2896_v16  ;;  %v3065_v51 = vld [vmem:[%s5567_s1 + $0x168] sm:$0xf0]  ;;  %v4056_v56 = vld [vmem:[%s5567_s1 + $0x54] sm:$0xf]  ;;  %s5611_s19 = smov (!%p215_p3, %s2858_s19), 1  ;;  %v3004_v57 = vor.u32 %v4074_v48, %v3001_v49  ;;  %v3184_v3 = vor.u32 %v4121_v55, %v3183_v52  ;;  %vm965_vm3 = vcmask 1043459  }
  0x27   : > { %758 = vmatpush.bf16.msra.mxu1 %v2960_v19  ;;  %v2929_v58 = vld [vmem:[%s5567_s1 + $0x58] sm:$0xf0]  ;;  %v4072_v59 = vld [vmem:[%s5567_s1 + $0xd4] sm:$0xf]  ;;  %v3068_v61 = vor.u32 %v4090_v50, %v3065_v51  ;;  %s4270_s10 = smul.u32 40, %s5611_s19  ;;  %vm968_vm5 = vcmask 1047559  }
  0x28   : > { %772 = vmatpush.bf16.msra.mxu2 %v3024_v20  ;;  %v2993_v60 = vld [vmem:[%s5567_s1 + $0xd8] sm:$0xf0]  ;;  %v4088_v62 = vld [vmem:[%s5567_s1 + $0x154] sm:$0xf]  ;;  %v3175_v0 = vld [vmem:[%s5567_s1 + $0x240] sm:$0xf]  ;;  %v2932_v4 = vor.u32 %v4056_v56, %v2929_v58 }
  0x29   : > { %786 = vmatpush.bf16.msra.mxu3 %v3088_v24  ;;  %v3057_v63 = vld [vmem:[%s5567_s1 + $0x158] sm:$0xf0]  ;;  %v4119_v1 = vld [vmem:[%s5567_s1 + $0x244] sm:$0xf0]  ;;  %v4054_v2 = vld [vmem:[%s5567_s1 + $0x44] sm:$0xf]  ;;  %s4621_s27 = scalar_lea.vmem %s5566_s0, %s4270_s10  ;;  %v2996_v8 = vor.u32 %v4072_v59, %v2993_v60 }
  0x2a   : > { %745 = vmatpush.bf16.msra.mxu0 %v2888_v31  ;;  %v2921_v5 = vld [vmem:[%s5567_s1 + $0x48] sm:$0xf0]  ;;  %v4070_v6 = vld [vmem:[%s5567_s1 + $0xc4] sm:$0xf]  ;;  %v2867_v9 = vld [vmem:[%s4621_s27] sm:$0xf]  ;;  %v3060_v13 = vor.u32 %v4088_v62, %v3057_v63  ;;  %v3176_v23 = vor.u32 %v4119_v1, %v3175_v0 }
  0x2b   : > { %759 = vmatpush.bf16.msra.mxu1 %v2952_v35  ;;  %v2985_v7 = vld [vmem:[%s5567_s1 + $0xc8] sm:$0xf0]  ;;  %v4043_v10 = vld [vmem:[%s4621_s27 + $0x10] sm:$0xf0]  ;;  %v4086_v11 = vld [vmem:[%s5567_s1 + $0x144] sm:$0xf]  ;;  %v2924_v24 = vor.u32 %v4054_v2, %v2921_v5 }
  0x2c   : > { %773 = vmatpush.bf16.msra.mxu2 %v3016_v36  ;;  %v2875_v12 = vld [vmem:[%s4621_s27 + $0x8] sm:$0xf]  ;;  %v4629_v14 = vor.u32 %v4043_v10, %v2867_v9  ;;  %v4044_v15 = vld [vmem:[%s4621_s27 + $0x18] sm:$0xf0]  ;;  %v4042_v16 = vld [vmem:[%s4621_s27 + $0xc] sm:$0xf]  ;;  %v2988_v27 = vor.u32 %v4070_v6, %v2985_v7 }
  0x2d   : > { %787 = vmatpush.bf16.msra.mxu3 %v3080_v43  ;;  %v2877_v17 = vld [vmem:[%s4621_s27 + $0x1c] sm:$0xf0]  ;;  %v3049_v18 = vld [vmem:[%s5567_s1 + $0x148] sm:$0xf0]  ;;  %v4637_v19 = vor.u32 %v4044_v15, %v2875_v12  ;;  %v4041_v21 = vld [vmem:[%s4621_s27 + $0x4] sm:$0xf] }
  0x2e   : > { %794 = vmatpush.bf16.msrb.mxu0 %v3200_v39  ;;  %v4639_v20 = vor.u32 %v4042_v16, %v2877_v17  ;;  %v2869_v22 = vld [vmem:[%s4621_s27 + $0x14] sm:$0xf0]  ;;  %v3167_v25 = vld [vmem:[%s5567_s1 + $0x230] sm:$0xf]  ;;  %v4052_v29 = vld [vmem:[%s5567_s1 + $0x34] sm:$0xf]  ;;  %v3052_v31 = vor.u32 %v4086_v11, %v3049_v18 }
  0x2f   : > { %808 = vmatpush.bf16.msrb.mxu1 %v2948_v40  ;;  %v4646_v26 = vor.u32 %v4041_v21, %v2869_v22  ;;  %746 = vmatmul.bf16.vlgmr.msra.gmra.mxu0 %v4629_v14  ;;  %v4117_v28 = vld [vmem:[%s5567_s1 + $0x234] sm:$0xf0]  ;;  %v2913_v30 = vld [vmem:[%s5567_s1 + $0x38] sm:$0xf0]  ;;  %v4068_v32 = vld [vmem:[%s5567_s1 + $0xb4] sm:$0xf] }
  0x30   : > { %822 = vmatpush.bf16.msrb.mxu2 %v3012_v42  ;;  %v2977_v33 = vld [vmem:[%s5567_s1 + $0xb8] sm:$0xf0]  ;;  %788 = vmatmul.bf16.vlgmr.msra.gmra.mxu3 %v4639_v20  ;;  %v4084_v34 = vld [vmem:[%s5567_s1 + $0x134] sm:$0xf]  ;;  %v3168_v36 = vor.u32 %v4117_v28, %v3167_v25  ;;  %v2916_v37 = vor.u32 %v4052_v29, %v2913_v30  ;;  %v3159_v38 = vld [vmem:[%s5567_s1 + $0x220] sm:$0xf] }
  0x31   : > { %836 = vmatpush.bf16.msrb.mxu3 %v3076_v47  ;;  %774 = vmatmul.bf16.vlgmr.msra.gmra.mxu2 %v4637_v19  ;;  %v3041_v35 = vld [vmem:[%s5567_s1 + $0x138] sm:$0xf0]  ;;  %v2980_v39 = vor.u32 %v4068_v32, %v2977_v33  ;;  %v4115_v40 = vld [vmem:[%s5567_s1 + $0x224] sm:$0xf0]  ;;  %v4050_v41 = vld [vmem:[%s5567_s1 + $0x24] sm:$0xf] }
  0x32   : > { %795 = vmatpush.bf16.msrb.mxu0 %v3192_v53  ;;  %760 = vmatmul.bf16.vlgmr.msra.gmra.mxu1 %v4646_v26  ;;  %v2905_v42 = vld [vmem:[%s5567_s1 + $0x28] sm:$0xf0]  ;;  %v3044_v43 = vor.u32 %v4084_v34, %v3041_v35  ;;  %v4066_v44 = vld [vmem:[%s5567_s1 + $0xa4] sm:$0xf]  ;;  %v3160_v48 = vor.u32 %v4115_v40, %v3159_v38  ;;  %v3151_v50 = vld [vmem:[%s5567_s1 + $0x210] sm:$0xf] }
  0x33   : > { %809 = vmatpush.bf16.msrb.mxu1 %v2940_v54  ;;  %v2969_v45 = vld [vmem:[%s5567_s1 + $0xa8] sm:$0xf0]  ;;  %v4082_v46 = vld [vmem:[%s5567_s1 + $0x124] sm:$0xf]  ;;  %v2908_v49 = vor.u32 %v4050_v41, %v2905_v42  ;;  %v4113_v52 = vld [vmem:[%s5567_s1 + $0x214] sm:$0xf0] }
  0x34   : > { %823 = vmatpush.bf16.msrb.mxu2 %v3004_v57  ;;  %v3033_v47 = vld [vmem:[%s5567_s1 + $0x128] sm:$0xf0]  ;;  %v2972_v51 = vor.u32 %v4066_v44, %v2969_v45  ;;  %v4048_v53 = vld [vmem:[%s5567_s1 + $0x14] sm:$0xf]  ;;  %v2897_v54 = vld [vmem:[%s5567_s1 + $0x18] sm:$0xf0]  ;;  %v3152_v60 = vor.u32 %v4113_v52, %v3151_v50 }
  0x35   : > { %837 = vmatpush.bf16.msrb.mxu3 %v3068_v61  ;;  %v3036_v55 = vor.u32 %v4082_v46, %v3033_v47  ;;  %v4064_v56 = vld [vmem:[%s5567_s1 + $0x94] sm:$0xf]  ;;  %v2961_v57 = vld [vmem:[%s5567_s1 + $0x98] sm:$0xf0]  ;;  %v2900_v61 = vor.u32 %v4048_v53, %v2897_v54  ;;  %v3143_v62 = vld [vmem:[%s5567_s1 + $0x200] sm:$0xf] }
  0x36   : > { %796 = vmatpush.bf16.msrb.mxu0 %v3184_v3  ;;  %v4080_v58 = vld [vmem:[%s5567_s1 + $0x114] sm:$0xf]  ;;  %v3025_v59 = vld [vmem:[%s5567_s1 + $0x118] sm:$0xf0]  ;;  %v4111_v63 = vld [vmem:[%s5567_s1 + $0x204] sm:$0xf0]  ;;  %v2964_v1 = vor.u32 %v4064_v56, %v2961_v57 }
  0x37   : > { %810 = vmatpush.bf16.msrb.mxu1 %v2932_v4  ;;  %v4046_v0 = vld [vmem:[%s5567_s1 + $0x4] sm:$0xf]  ;;  %v2889_v2 = vld [vmem:[%s5567_s1 + $0x8] sm:$0xf0]  ;;  %v3028_v5 = vor.u32 %v4080_v58, %v3025_v59  ;;  %v4108_v6 = vld [vmem:[%s5567_s1 + $0x1f4] sm:$0xf]  ;;  %v3144_v12 = vor.u32 %v4111_v63, %v3143_v62 }
  0x38   : > { %824 = vmatpush.bf16.msrb.mxu2 %v2996_v8  ;;  %v4062_v3 = vld [vmem:[%s5567_s1 + $0x84] sm:$0xf]  ;;  %v2953_v4 = vld [vmem:[%s5567_s1 + $0x88] sm:$0xf0]  ;;  %v3137_v7 = vld [vmem:[%s5567_s1 + $0x1f8] sm:$0xf0] }
  0x39   : > { %838 = vmatpush.bf16.msrb.mxu3 %v3060_v13  ;;  %v4124_v8 = vld [vmem:[%s5567_s1 + $0x274] sm:$0xf]  ;;  %v3201_v9 = vld [vmem:[%s5567_s1 + $0x278] sm:$0xf0]  ;;  %v4078_v10 = vld [vmem:[%s5567_s1 + $0x104] sm:$0xf]  ;;  %v2892_v13 = vor.u32 %v4046_v0, %v2889_v2  ;;  %v2956_v17 = vor.u32 %v4062_v3, %v2953_v4  ;;  %v3140_v18 = vor.u32 %v4108_v6, %v3137_v7 }
  0x3a   : > { %797 = vmatpush.bf16.msrb.mxu0 %v3176_v23  ;;  %v3017_v11 = vld [vmem:[%s5567_s1 + $0x108] sm:$0xf0]  ;;  %v2883_v15 = vld [vmem:[%s4621_s27 + $0x10] sm:$0xf]  ;;  %v4045_v16 = vld [vmem:[%s4621_s27 + $0x20] sm:$0xf0]  ;;  %v3204_v21 = vor.u32 %v4124_v8, %v3201_v9 }
  0x3b   : > { %811 = vmatpush.bf16.msrb.mxu1 %v2924_v24  ;;  %v3020_v22 = vor.u32 %v4078_v10, %v3017_v11  ;;  %v4106_v23 = vld [vmem:[%s5567_s1 + $0x1e4] sm:$0xf]  ;;  %v3129_v24 = vld [vmem:[%s5567_s1 + $0x1e8] sm:$0xf0]  ;;  %v4765_v25 = vor.u32 %v4045_v16, %v2883_v15  ;;  %v3121_v32 = vld [vmem:[%s5567_s1 + $0x1d8] sm:$0xf0] }
  0x3c   : > { %825 = vmatpush.bf16.msrb.mxu2 %v2988_v27  ;;  %v4122_v27 = vld [vmem:[%s5567_s1 + $0x264] sm:$0xf]  ;;  %v3193_v28 = vld [vmem:[%s5567_s1 + $0x268] sm:$0xf0]  ;;  %v3132_v29 = vor.u32 %v4106_v23, %v3129_v24  ;;  %v4120_v33 = vld [vmem:[%s5567_s1 + $0x254] sm:$0xf] }
  0x3d   : > { %839 = vmatpush.bf16.msrb.mxu3 %v3052_v31  ;;  %v3196_v30 = vor.u32 %v4122_v27, %v3193_v28  ;;  %v4104_v31 = vld [vmem:[%s5567_s1 + $0x1d4] sm:$0xf]  ;;  %v3185_v34 = vld [vmem:[%s5567_s1 + $0x258] sm:$0xf0]  ;;  %v3113_v38 = vld [vmem:[%s5567_s1 + $0x1c8] sm:$0xf0] }
  0x3e   : > { %798 = vmatpush.bf16.msrb.mxu0 %v3168_v36  ;;  %v3124_v35 = vor.u32 %v4104_v31, %v3121_v32  ;;  %v3188_v36 = vor.u32 %v4120_v33, %v3185_v34  ;;  %v4100_v40 = vld [vmem:[%s5567_s1 + $0x1b4] sm:$0xf]  ;;  %v3105_v41 = vld [vmem:[%s5567_s1 + $0x1b8] sm:$0xf0]  ;;  %v4098_v46 = vld [vmem:[%s5567_s1 + $0x1a4] sm:$0xf] }
  0x3f   : > { %812 = vmatpush.bf16.msrb.mxu1 %v2916_v37  ;;  %v4102_v37 = vld [vmem:[%s5567_s1 + $0x1c4] sm:$0xf]  ;;  %v4116_v42 = vld [vmem:[%s5567_s1 + $0x234] sm:$0xf]  ;;  %v3108_v44 = vor.u32 %v4100_v40, %v3105_v41  ;;  %v3097_v47 = vld [vmem:[%s5567_s1 + $0x1a8] sm:$0xf0] }
  0x40   : > { %826 = vmatpush.bf16.msrb.mxu2 %v2980_v39  ;;  %v3100_v50 = vor.u32 %v4098_v46, %v3097_v47  ;;  %v4096_v52 = vld [vmem:[%s5567_s1 + $0x194] sm:$0xf]  ;;  %v3089_v53 = vld [vmem:[%s5567_s1 + $0x198] sm:$0xf0]  ;;  %v4094_v58 = vld [vmem:[%s5567_s1 + $0x184] sm:$0xf] }
  0x41   : > { %840 = vmatpush.bf16.msrb.mxu3 %v3044_v43  ;;  %v3169_v43 = vld [vmem:[%s5567_s1 + $0x238] sm:$0xf0]  ;;  %v4112_v54 = vld [vmem:[%s5567_s1 + $0x214] sm:$0xf]  ;;  %v3092_v56 = vor.u32 %v4096_v52, %v3089_v53  ;;  %v3081_v59 = vld [vmem:[%s5567_s1 + $0x188] sm:$0xf0] }
  0x42   : > { %799 = vmatpush.bf16.msrb.mxu0 %v3160_v48  ;;  %v3172_v45 = vor.u32 %v4116_v42, %v3169_v43  ;;  %v4114_v48 = vld [vmem:[%s5567_s1 + $0x224] sm:$0xf]  ;;  %v3084_v62 = vor.u32 %v4094_v58, %v3081_v59  ;;  %v4140_v27 = vld [vmem:[%s5569_s3 + $0x70] sm:$0xff]  ;;  %v4149_v33 = vld [vmem:[%s5569_s3 + $0xb8] sm:$0xff]  ;;  %vm966_vm4 = vsmask.f32 7950 }
  0x43   : > { %813 = vmatpush.bf16.msrb.mxu1 %v2908_v49  ;;  %v3161_v49 = vld [vmem:[%s5567_s1 + $0x228] sm:$0xf0]  ;;  %v4157_v34 = vld [vmem:[%s5569_s3 + $0xf8] sm:$0xff]  ;;  %v4148_v41 = vld [vmem:[%s5569_s3 + $0xb0] sm:$0xff]  ;;  %vm969_vm6 = vsmask.f32 7966 }
  0x44   : > { %827 = vmatpush.bf16.msrb.mxu2 %v2972_v51  ;;  %v3164_v51 = vor.u32 %v4114_v48, %v3161_v49  ;;  %v4156_v42 = vld [vmem:[%s5569_s3 + $0xf0] sm:$0xff]  ;;  %v4894_v46 = vld [vmem:[%s5568_s2] sm:$0x3]  ;;  %v894_v49 = vlaneseq  ;;  %v4155_v58 = vld [vmem:[%s5569_s3 + $0xe8] sm:$0xff]  ;;  %vm990_vm8 = vcmask 1043458   ;;  %vm993_vm11 = vcmask 1047558  }
  0x45   : > { %841 = vmatpush.bf16.msrb.mxu3 %v3036_v55  ;;  %v3153_v55 = vld [vmem:[%s5567_s1 + $0x218] sm:$0xf0]  ;;  %v905_v53 = vperm.slane %v4894_v46, 0  ;;  %vm4961_vm7 = vmand %vm965_vm3, %vm966_vm4  ;;  %vm991_vm9 = vsmask.f32 7946  ;;  %vm975_vm13 = vcmask 1041408  }
  0x46   : > { %800 = vmatpush.bf16.msrb.mxu0 %v3152_v60  ;;  %v3156_v57 = vor.u32 %v4112_v54, %v3153_v55  ;;  %v4110_v60 = vld [vmem:[%s5567_s1 + $0x204] sm:$0xf]  ;;  %vm4970_vm10 = vmand %vm968_vm5, %vm969_vm6  ;;  %vm994_vm12 = vsmask.f32 7962  ;;  %vm976_vm14 = vsmask.f32 1280 }
  0x47   : > { %814 = vmatpush.bf16.msrb.mxu1 %v2900_v61  ;;  %v3145_v61 = vld [vmem:[%s5567_s1 + $0x208] sm:$0xf0]  ;;  %vm4998_vm4 = vmand %vm990_vm8, %vm991_vm9  ;;  %vm1003_vm5 = vcmask 1044484   ;;  %vm5573_vm6 = vsmask.f32 4352  ;;  %vm5584_vm8 = vcmask 1040384  }
  0x48   : > { %828 = vmatpush.bf16.msrb.mxu2 %v2964_v1  ;;  %v3148_v63 = vor.u32 %v4110_v60, %v3145_v61  ;;  %v4129_v61 = vld [vmem:[%s5569_s3 + $0x18] sm:$0xff]  ;;  %vm5010_vm3 = vmand %vm993_vm11, %vm994_vm12  ;;  %s4271_s20 = smul.u32 24, %s5611_s19 }
  0x49   : > { %842 = vmatpush.bf16.msrb.mxu3 %v3028_v5  ;;  %vm5031_vm11 = vmand %vm1003_vm5, %vm5573_vm6  ;;  %vm1034_vm6 = vcmask 1042432   ;;  %vm5591_vm5 = vcmask 1043457  }
  0x4a   : > { %801 = vmatpush.bf16.msrb.mxu0 %v3144_v12  ;;  %s224_s24 = scalar_lea.vmem %s5571_s5, %s4271_s20 }
  0x4b   : > { %815 = vmatpush.bf16.msrb.mxu1 %v2892_v13 }
  0x4c   : > { %829 = vmatpush.bf16.msrb.mxu2 %v2956_v17  ;;  %v4141_v17 = vld [vmem:[%s5569_s3 + $0x78] sm:$0xff] }
  0x4d   : > { %843 = vmatpush.bf16.msrb.mxu3 %v3020_v22  ;;  %802 = vmatmul.bf16.vlgmr.msrb.gmra.mxu0 %v4765_v25 }
  0x4e   : > { %850 = vmatpush.bf16.msra.mxu0 %v3140_v18  ;;  %816 = vmatmul.bf16.vlgmr.msrb.gmra.mxu1 %v4629_v14  ;;  %v4118_v14 = vld [vmem:[%s5567_s1 + $0x244] sm:$0xf] }
  0x4f   : > { %864 = vmatpush.bf16.msra.mxu1 %v3204_v21  ;;  %830 = vmatmul.bf16.vlgmr.msrb.gmra.mxu2 %v4646_v26  ;;  %v3177_v26 = vld [vmem:[%s5567_s1 + $0x248] sm:$0xf0] }
  0x50   : > { %844 = vmatmul.bf16.vlgmr.msrb.gmra.mxu3 %v4637_v19  ;;  %v3116_v19 = vor.u32 %v4102_v37, %v3113_v38  ;;  %v3180_v39 = vor.u32 %v4118_v14, %v3177_v26  ;;  %v4131_v37 = vld [vmem:[%s5569_s3 + $0x28] sm:$0xff]  ;;  %1260 = vmatpush.bf16.msra.mxu2 %v4149_v33 }
  0x51   : > { %v4139_v38 = vld [vmem:[%s5569_s3 + $0x68] sm:$0xff]  ;;  %1278 = vmatpush.bf16.msra.mxu3 %v4157_v34  ;;  %v4126_v34 = vld [vmem:[%s5569_s3] sm:$0xff] }
  0x52   : > { %851 = vmatpush.bf16.msra.mxu0 %v3132_v29 }
  0x53   : > { %865 = vmatpush.bf16.msra.mxu1 %v3196_v30  ;;  %v4290_v30 = vmov 0  }
  0x54   : > { %949 = vst [vmem:[#allocation2 + $0x8] sm:$0xff] %v4290_v30  ;;  %1261 = vmatpush.bf16.msra.mxu2 %v4148_v41 }
  0x55   : > { %950 = vst [vmem:[#allocation2] sm:$0xff] %v4290_v30  ;;  %1279 = vmatpush.bf16.msra.mxu3 %v4156_v42 }
  0x56   : > { %852 = vmatpush.bf16.msra.mxu0 %v3124_v35  ;;  %951 = vst [vmem:[#allocation2 + $0x20] sm:$0xff] %v4290_v30 }
  0x57   : > { %866 = vmatpush.bf16.msra.mxu1 %v3188_v36  ;;  %952 = vst [vmem:[#allocation2 + $0x10] sm:$0xff] %v4290_v30 }
  0x58   : > { %953 = vst [vmem:[#allocation2 + $0x18] sm:$0xff] %v4290_v30  ;;  %v4152_v30 = vld [vmem:[%s5569_s3 + $0xd0] sm:$0xff] }
  0x59   : > { %1280 = vmatpush.bf16.msra.mxu3 %v4155_v58 }
  0x5a   : > { %853 = vmatpush.bf16.msra.mxu0 %v3116_v19 }
  0x5b   : > { %867 = vmatpush.bf16.msra.mxu1 %v3180_v39 }
  0x5e   : > { %854 = vmatpush.bf16.msra.mxu0 %v3108_v44  ;;  %v4130_v44 = vld [vmem:[%s5569_s3 + $0x20] sm:$0xff] }
  0x5f   : > { %868 = vmatpush.bf16.msra.mxu1 %v3172_v45  ;;  %v4138_v45 = vld [vmem:[%s5569_s3 + $0x60] sm:$0xff] }
  0x62   : > { %855 = vmatpush.bf16.msra.mxu0 %v3100_v50 }
  0x63   : > { %869 = vmatpush.bf16.msra.mxu1 %v3164_v51  ;;  %v4147_v51 = vld [vmem:[%s5569_s3 + $0xa8] sm:$0xff] }
  0x64   : > { %1262 = vmatpush.bf16.msra.mxu2 %v4147_v51  ;;  %v4188_v51 = vld [vmem:[%s5569_s3 + $0x1f0] sm:$0xff] }
  0x66   : > { %856 = vmatpush.bf16.msra.mxu0 %v3092_v56  ;;  %v895_v56 = vand.u32 127, %v894_v49 }
  0x67   : > { %870 = vmatpush.bf16.msra.mxu1 %v3156_v57 }
  0x6a   : > { %857 = vmatpush.bf16.msra.mxu0 %v3084_v62 }
  0x6b   : > { %871 = vmatpush.bf16.msra.mxu1 %v3148_v63  ;;  %v4137_v63 = vld [vmem:[%s5569_s3 + $0x58] sm:$0xff] }
  0x6d   : > { %858 = vmatmul.bf16.vlgmr.msra.gmra.mxu0 %v4639_v20  ;;  %v4133_v20 = vld [vmem:[%s5569_s3 + $0x38] sm:$0xff] }
  0x6e   : > { %872 = vmatmul.bf16.vlgmr.msra.gmra.mxu1 %v4765_v25  ;;  %1398 = vmatpush.bf16.msrb.mxu0 %v4133_v20  ;;  %v4132_v25 = vld [vmem:[%s5569_s3 + $0x30] sm:$0xff]  ;;  %v4127_v20 = vld [vmem:[%s5569_s3 + $0x8] sm:$0xff] }
  0x6f   : > { %1416 = vmatpush.bf16.msrb.mxu1 %v4141_v17 }
  0x72   : > { %1399 = vmatpush.bf16.msrb.mxu0 %v4132_v25 }
  0x73   : > { %1417 = vmatpush.bf16.msrb.mxu1 %v4140_v27 }
  0x76   : > { %1400 = vmatpush.bf16.msrb.mxu0 %v4131_v37  ;;  %v4181_v37 = vld [vmem:[%s5569_s3 + $0x1b8] sm:$0xff] }
  0x77   : > { %1418 = vmatpush.bf16.msrb.mxu1 %v4139_v38  ;;  %v4189_v38 = vld [vmem:[%s5569_s3 + $0x1f8] sm:$0xff] }
  0x7a   : > { %1401 = vmatpush.bf16.msrb.mxu0 %v4130_v44 }
  0x7b   : > { %1419 = vmatpush.bf16.msrb.mxu1 %v4138_v45 }
  0x7e   : > { %1402 = vmatpush.bf16.msrb.mxu0 %v4129_v61 }
  0x7f   : > { %1420 = vmatpush.bf16.msrb.mxu1 %v4137_v63  ;;  %v972_v63 = vld [vmem:[#allocation2 + $0x8] sm:$0x88] }
  0xac   : > { %v747_v0 = vpop.f32.mrf.mxu0 }
  0xaf   : > { %v761_v1 = vpop.f32.mrf.mxu1 }
  0xb0   : > { %v762_v23 = vadd.f32 %v761_v1, %v747_v0  ;;  %v4146_v0 = vld [vmem:[%s5569_s3 + $0xa0] sm:$0xff] }
  0xb1   : > { %v4917_v1 = vld [vmem:[%s5568_s2 + $0x2] sm:$0x3]  ;;  %1263 = vmatpush.bf16.msra.mxu2 %v4146_v0  ;;  %v4179_v0 = vld [vmem:[%s5569_s3 + $0x1a8] sm:$0xff] }
  0xb3   : > { %v789_v4 = vpop.f32.mrf.mxu3 }
  0xb4   : > { %v775_v2 = vpop.f32.mrf.mxu2  ;;  %v749_v3 = vpop.f32.mrf.mxu0 }
  0xb5   : > { %v776_v35 = vadd.f32 %v775_v2, %v762_v23  ;;  %v896_v2 = vadd.s32 128, %v895_v56 }
  0xb7   : > { %v763_v5 = vpop.f32.mrf.mxu1  ;;  %v790_v43 = vadd.f32 %v789_v4, %v776_v35  ;;  %v4128_v4 = vld [vmem:[%s5569_s3 + $0x10] sm:$0xff]  ;;  %vm898_vm2 = vcmp.lt.s32.totalorder %v896_v2, 192  ;;  %v4134_v35 = vld [vmem:[%s5569_s3 + $0x40] sm:$0xff] }
  0xb8   : > { %v764_v29 = vadd.f32 %v763_v5, %v749_v3  ;;  %v4154_v3 = vld [vmem:[%s5569_s3 + $0xe0] sm:$0xff]  ;;  %1403 = vmatpush.bf16.msrb.mxu0 %v4128_v4 }
  0xb9   : > { %1281 = vmatpush.bf16.msra.mxu3 %v4154_v3 }
  0xbb   : > { %v791_v9 = vpop.f32.mrf.mxu3 }
  0xbc   : > { %v777_v6 = vpop.f32.mrf.mxu2  ;;  %1404 = vmatpush.bf16.msrb.mxu0 %v4127_v20 }
  0xbd   : > { %v778_v26 = vadd.f32 %v777_v6, %v764_v29  ;;  %v4136_v6 = vld [vmem:[%s5569_s3 + $0x50] sm:$0xff]  ;;  %v982_v29 = vld [vmem:[#allocation2] sm:$0x33] }
  0xbe   : > { %1421 = vmatpush.bf16.msrb.mxu1 %v4136_v6 }
  0xbf   : > { %v792_v48 = vadd.f32 %v791_v9, %v778_v26 }
  0xc0   : > { %1405 = vmatpush.bf16.msrb.mxu0 %v4126_v34 }
  0xc4   : > { %1771 = vmatpush.bf16.msra.mxu0 %v4181_v37 }
  0xca   : > { %v803_v7 = vpop.f32.mrf.mxu0 }
  0xcb   : > { %v817_v8 = vpop.f32.mrf.mxu1  ;;  %v804_v52 = vadd.f32 %v803_v7, %v790_v43  ;;  %v4145_v7 = vld [vmem:[%s5569_s3 + $0x98] sm:$0xff] }
  0xcc   : > { %1264 = vmatpush.bf16.msra.mxu2 %v4145_v7  ;;  %v4164_v7 = vld [vmem:[%s5569_s3 + $0x130] sm:$0xff] }
  0xcd   : > { %v909_v59 = vadd.f32 %v905_v53, %v804_v52 }
  0xcf   : > { %v917_v9 = vmul.f32 0.01, %v909_v59  ;;  %vm913_vm0 = vcmp.ge.f32.partialorder %v909_v59, 0.0 }
  0xd2   : > { %v831_v10 = vpop.f32.mrf.mxu2  ;;  %v805_v11 = vpop.f32.mrf.mxu0 }
  0xd3   : > { %v819_v12 = vpop.f32.mrf.mxu1  ;;  %v845_v13 = vpop.f32.mrf.mxu3  ;;  %v832_v18 = vadd.f32 %v831_v10, %v817_v8  ;;  %v806_v54 = vadd.f32 %v805_v11, %v792_v48  ;;  %v906_v8 = vperm.slane %v4894_v46, 1  ;;  %v928_v11 = vperm.slane %v4917_v1, 0  ;;  %v4142_v48 = vld [vmem:[%s5569_s3 + $0x80] sm:$0xff]  ;;  %v4184_v46 = vld [vmem:[%s5569_s3 + $0x1d0] sm:$0xff] }
  0xd5   : > { %v846_v28 = vadd.f32 %v845_v13, %v832_v18  ;;  %v911_v60 = vadd.f32 %v905_v53, %v806_v54  ;;  %v4135_v18 = vld [vmem:[%s5569_s3 + $0x48] sm:$0xff] }
  0xd6   : > { %1422 = vmatpush.bf16.msrb.mxu1 %v4135_v18 }
  0xd7   : > { %v919_v10 = vmul.f32 0.01, %v911_v60  ;;  %vm915_vm1 = vcmp.ge.f32.partialorder %v911_v60, 0.0 }
  0xd9   : > { %v923_v25 = vsel %vm915_vm1, %v911_v60, %v919_v10  ;;  %vm5572_vm1 = vsmask.f32 5376  ;;  %v4173_v60 = vld [vmem:[%s5569_s3 + $0x178] sm:$0xff]  ;;  %v4172_v10 = vld [vmem:[%s5569_s3 + $0x170] sm:$0xff] }
  0xda   : > { %v833_v15 = vpop.f32.mrf.mxu2  ;;  %1423 = vmatpush.bf16.msrb.mxu1 %v4134_v35  ;;  %v4171_v35 = vld [vmem:[%s5569_s3 + $0x168] sm:$0xff] }
  0xdb   : > { %v834_v22 = vadd.f32 %v833_v15, %v819_v12  ;;  %v847_v24 = vpop.f32.mrf.mxu3  ;;  %v4936_v12 = vld [vmem:[%s5568_s2 + $0x4] sm:$0x3]  ;;  %v4153_v15 = vld [vmem:[%s5569_s3 + $0xd8] sm:$0xff] }
  0xdc   : > { %v939_v23 = vperm.slane %v4936_v12, 0  ;;  %1282 = vmatpush.bf16.msra.mxu3 %v4153_v15  ;;  %v1007_v15 = vld [vmem:[#allocation2 + $0x20] sm:$0x11] }
  0xdd   : > { %v848_v31 = vadd.f32 %v847_v24, %v834_v22  ;;  %v921_v22 = vsel %vm913_vm0, %v909_v59, %v917_v9  ;;  %v940_v24 = vperm.slane %v4936_v12, 1  ;;  %v4165_v59 = vld [vmem:[%s5569_s3 + $0x138] sm:$0xff] }
  0xde   : > { %1789 = vmatpush.bf16.msra.mxu1 %v4189_v38  ;;  %v4213_v9 = vld [vmem:[%s5569_s3 + $0x2b8] sm:$0xff] }
  0xe0   : > { %1283 = vmatpush.bf16.msra.mxu3 %v4152_v30 }
  0xe2   : > { %1790 = vmatpush.bf16.msra.mxu1 %v4188_v51  ;;  %v4183_v51 = vld [vmem:[%s5569_s3 + $0x1c8] sm:$0xff] }
  0xea   : > { %v859_v16 = vpop.f32.mrf.mxu0 }
  0xeb   : > { %v873_v21 = vpop.f32.mrf.mxu1  ;;  %v860_v32 = vadd.f32 %v859_v16, %v846_v28  ;;  %v929_v16 = vperm.slane %v4917_v1, 1  ;;  %v4187_v1 = vld [vmem:[%s5569_s3 + $0x1e8] sm:$0xff] }
  0xec   : > { %1791 = vmatpush.bf16.msra.mxu1 %v4187_v1 }
  0xed   : > { %v4875_v39 = vadd.f32 %v873_v21, %v860_v32  ;;  %v4144_v21 = vld [vmem:[%s5569_s3 + $0x90] sm:$0xff] }
  0xee   : > { %1265 = vmatpush.bf16.msra.mxu2 %v4144_v21 }
  0xf2   : > { %v861_v36 = vpop.f32.mrf.mxu0 }
  0xf3   : > { %v862_v14 = vadd.f32 %v861_v36, %v848_v31  ;;  %v875_v19 = vpop.f32.mrf.mxu1  ;;  %v4143_v36 = vld [vmem:[%s5569_s3 + $0x88] sm:$0xff] }
  0xf4   : > { %1266 = vmatpush.bf16.msra.mxu2 %v4143_v36 }
  0xf5   : > { %v4877_v40 = vadd.f32 %v875_v19, %v862_v14  ;;  %v932_v19 = vmul.f32 %v928_v11, %v921_v22 }
  0xf7   : > { %v885_v47 = vadd.f32 %v4877_v40, %v4875_v39  ;;  %v943_v52 = vadd.f32 %v939_v23, %v932_v19 }
  0xf8   : > { %1267 = vmatpush.bf16.msra.mxu2 %v4142_v48  ;;  %v4169_v48 = vld [vmem:[%s5569_s3 + $0x158] sm:$0xff] }
  0xf9   : > { %v886_v50 = vrot.slane %v885_v47, 4 }
  0xfb   : > { %v887_v55 = vadd.f32 %v886_v50, %v885_v47  ;;  %v4180_v50 = vld [vmem:[%s5569_s3 + $0x1b0] sm:$0xff]  ;;  %v4161_v47 = vld [vmem:[%s5569_s3 + $0x118] sm:$0xff] }
  0xfc   : > { %1772 = vmatpush.bf16.msra.mxu0 %v4180_v50  ;;  %1580 = vmatpush.bf16.msrb.mxu2 %v4165_v59  ;;  %v4175_v50 = vld [vmem:[%s5569_s3 + $0x188] sm:$0xff] }
  0xfd   : > { %v888_v57 = vrot.slane %v887_v55, 2 }
  0xff   : > { %v889_v62 = vadd.f32 %v888_v57, %v887_v55  ;;  %v4150_v57 = vld [vmem:[%s5569_s3 + $0xc0] sm:$0xff] }
 0x100   : > { %1773 = vmatpush.bf16.msra.mxu0 %v4179_v0  ;;  %1581 = vmatpush.bf16.msrb.mxu2 %v4164_v7 }
 0x101   : > { %v890_v5 = vrot.slane %v889_v62, 1 }
 0x103   : > { %v891_v13 = vadd.f32 %v890_v5, %v889_v62 }
 0x105   : > { %v893_v17 = vmul.f32 0.0625, %v891_v13 }
 0x107   : > { %v900_v27 = vsel %vm898_vm2, %v4875_v39, %v893_v17  ;;  %v902_v28 = vsel %vm898_vm2, %v4877_v40, %v893_v17  ;;  %v934_v39 = vmul.f32 %v928_v11, %v923_v25  ;;  %vm1001_vm2 = vsmask.f32 256  ;;  %v4151_v40 = vld [vmem:[%s5569_s3 + $0xc8] sm:$0xff] }
 0x108   : > { %v910_v31 = vadd.f32 %v906_v8, %v900_v27  ;;  %v912_v32 = vadd.f32 %v906_v8, %v902_v28  ;;  %vm5019_vm9 = vmand %vm5584_vm8, %vm1001_vm2  ;;  %1284 = vmatpush.bf16.msra.mxu3 %v4151_v40  ;;  %vm1035_vm8 = vsmask.f32 2306  ;;  %v997_v8 = vld [vmem:[#allocation2] sm:$0xcc]  ;;  %vm5594_vm2 = vcmask 1047557   ;;  %v4185_v40 = vld [vmem:[%s5569_s3 + $0x1d8] sm:$0xff] }
 0x109   : > { %v945_v53 = vadd.f32 %v939_v23, %v934_v39  ;;  %v4178_v23 = vld [vmem:[%s5569_s3 + $0x1a0] sm:$0xff]  ;;  %v4177_v39 = vld [vmem:[%s5569_s3 + $0x198] sm:$0xff] }
 0x10a   : > { %vm914_vm15 = vcmp.ge.f32.partialorder %v910_v31, 0.0  ;;  %vm916_vm0 = vcmp.ge.f32.partialorder %v912_v32, 0.0  ;;  %v918_v14 = vmul.f32 0.01, %v910_v31  ;;  %v920_v26 = vmul.f32 0.01, %v912_v32  ;;  %1774 = vmatpush.bf16.msra.mxu0 %v4178_v23 }
 0x10c   : > { %v922_v41 = vsel %vm914_vm15, %v910_v31, %v918_v14  ;;  %v924_v42 = vsel %vm916_vm0, %v912_v32, %v920_v26  ;;  %vm5004_vm15 = vmand %vm975_vm13, %vm976_vm14  ;;  %vm978_vm0 = vcmask 1045508   ;;  %vm1020_vm14 = vsmask.f32 3334  ;;  %1285 = vmatpush.bf16.msra.mxu3 %v4150_v57  ;;  %v1026_v31 = vld [vmem:[#allocation2 + $0x20] sm:$0xee]  ;;  %v4163_v32 = vld [vmem:[%s5569_s3 + $0x128] sm:$0xff] }
 0x10d   : > { %v933_v44 = vmul.f32 %v929_v16, %v922_v41  ;;  %v935_v45 = vmul.f32 %v929_v16, %v924_v42  ;;  %vm5040_vm12 = vmand %vm978_vm0, %vm5572_vm1  ;;  %vm1023_vm0 = vsmask.f32 7446  ;;  %v1041_v14 = vld [vmem:[#allocation2 + $0x10] sm:$0x77]  ;;  %1582 = vmatpush.bf16.msrb.mxu2 %v4163_v32  ;;  %v4162_v42 = vld [vmem:[%s5569_s3 + $0x120] sm:$0xff] }
 0x10e   : > { %vm5066_vm1 = vmand %vm5591_vm5, %vm1020_vm14  ;;  %vm5600_vm5 = vcmask 1046532   ;;  %1775 = vmatpush.bf16.msra.mxu0 %v4177_v39 }
 0x10f   : > { %v944_v54 = vadd.f32 %v940_v24, %v933_v44  ;;  %v946_v55 = vadd.f32 %v940_v24, %v935_v45  ;;  %vm5075_vm13 = vmand %vm5594_vm2, %vm1023_vm0  ;;  %vm5599_vm2 = vsmask.f32 6418  ;;  %v4186_v24 = vld [vmem:[%s5569_s3 + $0x1e0] sm:$0xff]  ;;  %v4176_v45 = vld [vmem:[%s5569_s3 + $0x190] sm:$0xff] }
 0x110   : > { %1598 = vmatpush.bf16.msrb.mxu3 %v4173_v60  ;;  %vm5084_vm14 = vmand %vm1034_vm6, %vm1035_vm8  ;;  %1792 = vmatpush.bf16.msra.mxu1 %v4186_v24  ;;  %v4170_v44 = vld [vmem:[%s5569_s3 + $0x160] sm:$0xff] }
 0x111   : > { %v947_v61 = vpack.c.bf16 %v944_v54, %v943_v52  ;;  %v948_v62 = vpack.c.bf16 %v946_v55, %v945_v53  ;;  %vm5090_vm0 = vmand %vm5600_vm5, %vm5599_vm2  ;;  %1583 = vmatpush.bf16.msrb.mxu2 %v4162_v42  ;;  %v4160_v53 = vld [vmem:[%s5569_s3 + $0x110] sm:$0xff]  ;;  %v4158_v24 = vld [vmem:[%s5569_s3 + $0x100] sm:$0xff] }
 0x112   : > { %vm5603_vm6 = vmor %vm4970_vm10, %vm4961_vm7  ;;  %1776 = vmatpush.bf16.msra.mxu0 %v4176_v45  ;;  %v4203_v42 = vld [vmem:[%s5569_s3 + $0x268] sm:$0xff] }
 0x113   : > { %v955_v2 = vshll.u32 %v947_v61, 16  ;;  %v958_v3 = vshrl.u32 %v947_v61, 16  ;;  %v1011_v4 = vshrl.u32 %v948_v62, 16  ;;  %v1014_v5 = vshll.u32 %v948_v62, 16  ;;  %vm1025_vm8 = vmor %vm5075_vm13, %vm5066_vm1  ;;  %v4168_v62 = vld [vmem:[%s5569_s3 + $0x150] sm:$0xff] }
 0x114   : > { %vm981_vm7 = vmor %vm5040_vm12, %vm5004_vm15  ;;  %1599 = vmatpush.bf16.msrb.mxu3 %v4172_v10  ;;  %1793 = vmatpush.bf16.msra.mxu1 %v4185_v40  ;;  %v4221_v10 = vld [vmem:[%s5569_s3 + $0x2f8] sm:$0xff]  ;;  %vm1129_vm1 = vsmask.f32 7424  ;;  %vm5606_vm15 = vsmask.f32 4352  ;;  %vm2251_vm13 = vcmask 1045504  }
 0x115   : > { %v957_v11 = vrot.slane %v955_v2, 5  ;;  %v960_v12 = vrot.slane %v958_v3, 4  ;;  %v985_v13 = vrot.slane %v958_v3, 7  ;;  %v1013_v16 = vrot.slane %v1011_v4, 6  ;;  %vm5604_vm10 = vmor %vm5010_vm3, %vm4998_vm4  ;;  %1584 = vmatpush.bf16.msrb.mxu2 %v4161_v47  ;;  %v4174_v3 = vld [vmem:[%s5569_s3 + $0x180] sm:$0xff] }
 0x116   : > { %v1016_v17 = vrot.slane %v1014_v5, 7  ;;  %v1029_v18 = vrot.slane %v1011_v4, 5  ;;  %v1030_v21 = vrot.slane %v1014_v5, 6  ;;  %vm5605_vm2 = vmor %vm5031_vm11, %vm5019_vm9  ;;  %1777 = vmatpush.bf16.msra.mxu0 %v4175_v50  ;;  %v4182_v4 = vld [vmem:[%s5569_s3 + $0x1c0] sm:$0xff]  ;;  %v4159_v5 = vld [vmem:[%s5569_s3 + $0x108] sm:$0xff]  ;;  %vm1664_vm3 = vcmask 1044480  }
 0x117   : > { %v961_v25 = vor.u32 %v960_v12, %v957_v11  ;;  %v973_v27 = vsel %vm5603_vm6, %v957_v11, %v972_v63  ;;  %v986_v28 = vor.u32 %v985_v13, %v955_v2  ;;  %v987_v30 = vrot.slane %v985_v13, 4  ;;  %vm1040_vm5 = vmor %vm5090_vm0, %vm5084_vm14  ;;  %v4167_v12 = vld [vmem:[%s5569_s3 + $0x148] sm:$0xff] }
 0x118   : > { %974 = vst [vmem:[#allocation2 + $0x8] sm:$0x88] %v973_v27  ;;  %v1017_v33 = vor.u32 %v1016_v17, %v1013_v16  ;;  %v1031_v34 = vor.u32 %v1030_v21, %v1029_v18  ;;  %1600 = vmatpush.bf16.msrb.mxu3 %v4171_v35  ;;  %1794 = vmatpush.bf16.msra.mxu1 %v4184_v46  ;;  %v4212_v21 = vld [vmem:[%s5569_s3 + $0x2b0] sm:$0xff]  ;;  %v4219_v35 = vld [vmem:[%s5569_s3 + $0x2e8] sm:$0xff]  ;;  %vm1473_vm4 = vcmask 1046528   ;;  %vm5607_vm9 = vmmov %vm5606_vm15 }
 0x119   : > { %v962_v36 = vrot.slane %v961_v25, 4  ;;  %v998_v37 = vsel %vm5604_vm10, %v986_v28, %v997_v8  ;;  %v1008_v38 = vsel %vm5605_vm2, %v987_v30, %v1007_v15  ;;  %1585 = vmatpush.bf16.msrb.mxu2 %v4160_v53  ;;  %v4166_v28 = vld [vmem:[%s5569_s3 + $0x140] sm:$0xff]  ;;  %v4220_v30 = vld [vmem:[%s5569_s3 + $0x2f0] sm:$0xff]  ;;  %vm5608_vm11 = vsmask.f32 5376 }
 0x11a   : > { %999 = vst [vmem:[#allocation2] sm:$0xcc] %v998_v37  ;;  %v1027_v26 = vsel %vm1025_vm8, %v1017_v33, %v1026_v31  ;;  %v1032_v19 = vrot.slane %v1031_v34, 4  ;;  %1778 = vmatpush.bf16.msra.mxu0 %v4174_v3  ;;  %v4205_v33 = vld [vmem:[%s5569_s3 + $0x278] sm:$0xff]  ;;  %v4211_v34 = vld [vmem:[%s5569_s3 + $0x2a8] sm:$0xff]  ;;  %v4204_v37 = vld [vmem:[%s5569_s3 + $0x270] sm:$0xff] }
 0x11b   : > { %v983_v41 = vsel %vm981_vm7, %v962_v36, %v982_v29  ;;  %1009 = vst [vmem:[#allocation2 + $0x20] sm:$0x11] %v1008_v38  ;;  %v4197_v29 = vld [vmem:[%s5569_s3 + $0x238] sm:$0xff]  ;;  %v4196_v36 = vld [vmem:[%s5569_s3 + $0x230] sm:$0xff]  ;;  %v4210_v38 = vld [vmem:[%s5569_s3 + $0x2a0] sm:$0xff] }
 0x11c   : > { %984 = vst [vmem:[#allocation2] sm:$0x33] %v983_v41  ;;  %v1042_v43 = vsel %vm1040_vm5, %v1032_v19, %v1041_v14  ;;  %1601 = vmatpush.bf16.msrb.mxu3 %v4170_v44  ;;  %1795 = vmatpush.bf16.msra.mxu1 %v4183_v51  ;;  %v4218_v14 = vld [vmem:[%s5569_s3 + $0x2e0] sm:$0xff]  ;;  %v2397_v19 = vld [vmem:[#allocation2 + $0x18] sm:$0x77]  ;;  %v4195_v41 = vld [vmem:[%s5569_s3 + $0x228] sm:$0xff] }
 0x11d   : > { %1028 = vst [vmem:[#allocation2 + $0x20] sm:$0xee] %v1027_v26  ;;  %1586 = vmatpush.bf16.msrb.mxu2 %v4159_v5  ;;  %v4209_v44 = vld [vmem:[%s5569_s3 + $0x298] sm:$0xff]  ;;  %v2432_v46 = vunpack.c.l.b16 %v2397_v19  ;;  %v2433_v50 = vunpack.c.h.b16 %v2397_v19  ;;  %v4202_v53 = vld [vmem:[%s5569_s3 + $0x260] sm:$0xff]  ;;  %v4191_v19 = vld [vmem:[%s5569_s3 + $0x208] sm:$0xff] }
 0x11e   : > { %1043 = vst [vmem:[#allocation2 + $0x10] sm:$0x77] %v1042_v43  ;;  %vm5609_vm12 = vmmov %vm5608_vm11 }
 0x11f   : > { %v1044_v49 = vld [vmem:[#allocation2 + $0x8] sm:$0xff] }
 0x120   : > { %v1117_v54 = vunpack.c.l.b16 %v1044_v49  ;;  %v1118_v56 = vunpack.c.h.b16 %v1044_v49  ;;  %1602 = vmatpush.bf16.msrb.mxu3 %v4169_v48  ;;  %1796 = vmatpush.bf16.msra.mxu1 %v4182_v4  ;;  %v1619_v47 = vld [vmem:[#allocation2 + $0x8] sm:$0x88]  ;;  %v4217_v48 = vld [vmem:[%s5569_s3 + $0x2d8] sm:$0xff]  ;;  %v4216_v4 = vld [vmem:[%s5569_s3 + $0x2d0] sm:$0xff] }
 0x121   : > { %1587 = vmatpush.bf16.msrb.mxu2 %v4158_v24  ;;  %v2609_v51 = vld [vmem:[#allocation2] sm:$0x88]  ;;  %v1657_v3 = vunpack.c.h.b16 %v1619_v47 }
 0x123   : > { %v1045_v52 = vld [vmem:[#allocation2] sm:$0xff] }
 0x124   : > { %v5176_v55 = vunpack.c.l.b16 %v1045_v52  ;;  %v5178_v57 = vunpack.c.h.b16 %v1045_v52  ;;  %v1046_v58 = vld [vmem:[#allocation2 + $0x20] sm:$0xff]  ;;  %1603 = vmatpush.bf16.msrb.mxu3 %v4168_v62 }
 0x125   : > { %v1079_v59 = vld [vmem:[#allocation2 + $0x10] sm:$0x11]  ;;  %v5180_v60 = vunpack.c.l.b16 %v1046_v58  ;;  %v5182_v61 = vunpack.c.h.b16 %v1046_v58  ;;  %v4194_v52 = vld [vmem:[%s5569_s3 + $0x220] sm:$0xff] }
 0x126   : > { %v1125_v63 = vpack.c.b16 %v5176_v55, %v1117_v54  ;;  %v1126_v0 = vpack.c.b16 %v5178_v57, %v1118_v56  ;;  %v1123_v1 = vunpack.c.l.b16 %v1079_v59  ;;  %v1124_v2 = vunpack.c.h.b16 %v1079_v59  ;;  %v1810_v26 = vld [vmem:[#allocation2 + $0x10] sm:$0xff] }
 0x127   : > { %v1296_v39 = vpack.c.b16 %v5180_v60, %v5180_v60  ;;  %v1297_v40 = vpack.c.b16 %v5182_v61, %v5182_v61  ;;  %v1620_v43 = vld [vmem:[#allocation2 + $0x10] sm:$0x77]  ;;  %v5269_v45 = vunpack.c.l.b16 %v1810_v26  ;;  %v5274_v49 = vunpack.c.h.b16 %v1810_v26 }
 0x128   : > { %1406 = vmatmul.bf16.vlgmr.msrb.gmra.mxu0 %v1125_v63  ;;  %1424 = vmatmul.bf16.vlgmr.msrb.gmra.mxu1 %v1126_v0  ;;  %v5199_v6 = vpack.c.b16 %v1123_v1, %v5180_v60  ;;  %v1133_v7 = vshll.u32 %v1125_v63, 16  ;;  %v5202_v8 = vpack.c.b16 %v1124_v2, %v5182_v61  ;;  %v1145_v11 = vshll.u32 %v1126_v0, 16  ;;  %v4208_v59 = vld [vmem:[%s5569_s3 + $0x290] sm:$0xff] }
 0x129   : > { %v1131_v13 = vshrl.u32 %v1125_v63, 16  ;;  %v1143_v17 = vshrl.u32 %v1126_v0, 16  ;;  %2159 = vmatpush.bf16.msrb.mxu0 %v4213_v9  ;;  %2177 = vmatpush.bf16.msrb.mxu1 %v4221_v10  ;;  %v1658_v56 = vunpack.c.l.b16 %v1620_v43  ;;  %v1659_v58 = vunpack.c.h.b16 %v1620_v43  ;;  %v4245_v43 = vld [vmem:[%s5569_s3 + $0x3b8] sm:$0xff] }
 0x12a   : > { %v1135_v15 = vrot.slane %v1133_v7, 1  ;;  %v1138_v16 = vshll.u32 %v5199_v6, 16  ;;  %v1150_v20 = vshll.u32 %v5202_v8, 16  ;;  %v1147_v18 = vrot.slane %v1145_v11, 1  ;;  %1604 = vmatpush.bf16.msrb.mxu3 %v4167_v12 }
 0x12b   : > { %v1154_v54 = vshrl.u32 %v5199_v6, 16  ;;  %v1157_v62 = vshrl.u32 %v5202_v8, 16  ;;  %v1656_v63 = vunpack.c.l.b16 %v1619_v47  ;;  %v5288_v0 = vpack.c.b16 %v2432_v46, %v5269_v45 }
 0x12c   : > { %v1136_v22 = vor.u32 %v1135_v15, %v1131_v13  ;;  %v1140_v23 = vrot.slane %v1138_v16, 1  ;;  %v1148_v25 = vor.u32 %v1147_v18, %v1143_v17  ;;  %v5221_v27 = vrot.slane %v1150_v20, 1  ;;  %v4193_v15 = vld [vmem:[%s5569_s3 + $0x218] sm:$0xff]  ;;  %v4207_v20 = vld [vmem:[%s5569_s3 + $0x288] sm:$0xff] }
 0x12d   : > { %2160 = vmatpush.bf16.msrb.mxu0 %v4212_v21  ;;  %2178 = vmatpush.bf16.msrb.mxu1 %v4220_v30  ;;  %v2644_v1 = vunpack.c.l.b16 %v2609_v51  ;;  %v5294_v5 = vpack.c.b16 %v2433_v50, %v5274_v49  ;;  %v2645_v7 = vunpack.c.h.b16 %v2609_v51  ;;  %v5298_v10 = vpack.c.b16 %v5176_v55, %v1656_v63  ;;  %v4201_v16 = vld [vmem:[%s5569_s3 + $0x258] sm:$0xff]  ;;  %v1434_v21 = vld [vmem:[#allocation2 + $0x8] sm:$0xee]  ;;  %v4198_v50 = vld [vmem:[%s5569_s3 + $0x240] sm:$0xff] }
 0x12e   : > { %v1141_v31 = vsel %vm1129_vm1, %v1136_v22, %v1140_v23  ;;  %v1153_v32 = vsel %vm1129_vm1, %v1148_v25, %v5221_v27  ;;  %1605 = vmatpush.bf16.msrb.mxu3 %v4166_v28  ;;  %v1156_v2 = vor.u32 %v1154_v54, %v1140_v23  ;;  %v1159_v9 = vor.u32 %v1157_v62, %v5221_v27  ;;  %v4215_v22 = vld [vmem:[%s5569_s3 + $0x2c8] sm:$0xff]  ;;  %v4192_v27 = vld [vmem:[%s5569_s3 + $0x210] sm:$0xff] }
 0x12f   : > { %1268 = vmatmul.bf16.vlgmr.msra.gmra.mxu2 %v1141_v31  ;;  %1286 = vmatmul.bf16.vlgmr.msra.gmra.mxu3 %v1153_v32  ;;  %v5301_v11 = vpack.c.b16 %v1658_v56, %v5180_v60  ;;  %v5304_v12 = vpack.c.b16 %v5178_v57, %v1657_v3  ;;  %v5307_v13 = vpack.c.b16 %v1659_v58, %v5182_v61  ;;  %v2649_v18 = vrot.slane %v5288_v0, 3  ;;  %v4200_v28 = vld [vmem:[%s5569_s3 + $0x250] sm:$0xff]  ;;  %v4237_v58 = vld [vmem:[%s5569_s3 + $0x378] sm:$0xff]  ;;  %v4251_v62 = vld [vmem:[%s5569_s3 + $0x3e8] sm:$0xff] }
 0x130   : > { %1983 = vmatpush.bf16.msra.mxu2 %v4197_v29  ;;  %v2646_v17 = vpack.c.b16 %v5180_v60, %v2644_v1  ;;  %v2647_v23 = vpack.c.b16 %v5182_v61, %v2645_v7  ;;  %v2652_v24 = vrot.slane %v5294_v5, 3  ;;  %v1665_v25 = vrot.slane %v5298_v10, 3  ;;  %v4228_v63 = vld [vmem:[%s5569_s3 + $0x330] sm:$0xff]  ;;  %v4250_v3 = vld [vmem:[%s5569_s3 + $0x3e0] sm:$0xff]  ;;  %v4235_v7 = vld [vmem:[%s5569_s3 + $0x368] sm:$0xff] }
 0x131   : > { %2161 = vmatpush.bf16.msrb.mxu0 %v4211_v34  ;;  %2179 = vmatpush.bf16.msrb.mxu1 %v4219_v35  ;;  %v1666_v31 = vrot.slane %v5301_v11, 3  ;;  %v1668_v32 = vrot.slane %v5304_v12, 3  ;;  %v1669_v29 = vrot.slane %v5307_v13, 3  ;;  %v1469_v35 = vunpack.c.l.b16 %v1434_v21  ;;  %v4236_v1 = vld [vmem:[%s5569_s3 + $0x370] sm:$0xff]  ;;  %v4249_v13 = vld [vmem:[%s5569_s3 + $0x3d8] sm:$0xff]  ;;  %v4234_v11 = vld [vmem:[%s5569_s3 + $0x360] sm:$0xff] }
 0x132   : > { %2001 = vmatpush.bf16.msra.mxu3 %v4205_v33  ;;  %v2648_v30 = vrot.slane %v2646_v17, 3  ;;  %v4206_v33 = vld [vmem:[%s5569_s3 + $0x280] sm:$0xff]  ;;  %v2651_v34 = vrot.slane %v2647_v23, 3  ;;  %v1475_v47 = vrot.slane %v5199_v6, 1  ;;  %v4244_v6 = vld [vmem:[%s5569_s3 + $0x3b0] sm:$0xff]  ;;  %v1847_v17 = vpack.c.b16 %v5269_v45, %v5180_v60  ;;  %v4233_v23 = vld [vmem:[%s5569_s3 + $0x358] sm:$0xff] }
 0x133   : > { %v1471_v26 = vpack.c.b16 %v5176_v55, %v1469_v35  ;;  %v1870_v35 = vshll.u32 %v5304_v12, 16 }
 0x134   : > { %1984 = vmatpush.bf16.msra.mxu2 %v4196_v36  ;;  %v5341_v36 = vsel %vm1664_vm3, %v2648_v30, %v2649_v18  ;;  %v1853_v30 = vshll.u32 %v5298_v10, 16 }
 0x135   : > { %2162 = vmatpush.bf16.msrb.mxu0 %v4210_v38  ;;  %2180 = vmatpush.bf16.msrb.mxu1 %v4218_v14  ;;  %v4214_v38 = vld [vmem:[%s5569_s3 + $0x2c0] sm:$0xff]  ;;  %v5349_v14 = vsel %vm1664_vm3, %v2651_v34, %v2652_v24  ;;  %v1474_v46 = vrot.slane %v1471_v26, 1  ;;  %v1867_v34 = vshrl.u32 %v5304_v12, 16  ;;  %v2055_v26 = vpack.c.b16 %v5180_v60, %v5176_v55  ;;  %v4231_v55 = vld [vmem:[%s5569_s3 + $0x348] sm:$0xff] }
 0x136   : > { %2002 = vmatpush.bf16.msra.mxu3 %v4204_v37  ;;  %v1470_v37 = vunpack.c.h.b16 %v1434_v21  ;;  %v1848_v21 = vpack.c.b16 %v5274_v49, %v5182_v61  ;;  %v1855_v12 = vrot.slane %v1853_v30, 4 }
 0x137   : > { %v1476_v54 = vsel %vm1473_vm4, %v1474_v46, %v1475_v47 }
 0x138   : > { %1411 = vmatmul.bf16.gmra.mxu0 %v1296_v39  ;;  %1429 = vmatmul.bf16.gmra.mxu1 %v1297_v40  ;;  %v4199_v39 = vld [vmem:[%s5569_s3 + $0x248] sm:$0xff]  ;;  %v1667_v40 = vsel %vm1664_vm3, %v1665_v25, %v1666_v31 }
 0x139   : > { %1985 = vmatpush.bf16.msra.mxu2 %v4195_v41  ;;  %2163 = vmatpush.bf16.msrb.mxu0 %v4209_v44  ;;  %v1670_v41 = vsel %vm1664_vm3, %v1668_v32, %v1669_v29  ;;  %v4253_v44 = vld [vmem:[%s5569_s3 + $0x3f8] sm:$0xff]  ;;  %v4239_v25 = vld [vmem:[%s5569_s3 + $0x388] sm:$0xff]  ;;  %v1861_v32 = vshll.u32 %v1847_v17, 16 }
 0x13a   : > { %2003 = vmatpush.bf16.msra.mxu3 %v4203_v42  ;;  %2181 = vmatpush.bf16.msrb.mxu1 %v4217_v48  ;;  %v1472_v42 = vpack.c.b16 %v5178_v57, %v1470_v37  ;;  %v4190_v48 = vld [vmem:[%s5569_s3 + $0x200] sm:$0xff]  ;;  %v1875_v37 = vshrl.u32 %v1848_v21, 16 }
 0x13c   : > { %v1477_v51 = vrot.slane %v1472_v42, 1  ;;  %v1863_v42 = vrot.slane %v1861_v32, 4  ;;  %v1877_v46 = vrot.slane %v1875_v37, 3  ;;  %v2201_v32 = vld [vmem:[#allocation2 + $0x18] sm:$0x33] }
 0x13d   : > { %1986 = vmatpush.bf16.msra.mxu2 %v4194_v52  ;;  %2164 = vmatpush.bf16.msrb.mxu0 %v4208_v59  ;;  %v1478_v52 = vrot.slane %v5202_v8, 1  ;;  %v4229_v8 = vld [vmem:[%s5569_s3 + $0x338] sm:$0xff]  ;;  %v4243_v59 = vld [vmem:[%s5569_s3 + $0x3a8] sm:$0xff] }
 0x13e   : > { %2004 = vmatpush.bf16.msra.mxu3 %v4202_v53  ;;  %2182 = vmatpush.bf16.msrb.mxu1 %v4216_v4  ;;  %v4252_v53 = vld [vmem:[%s5569_s3 + $0x3f0] sm:$0xff]  ;;  %v4227_v4 = vld [vmem:[%s5569_s3 + $0x328] sm:$0xff] }
 0x13f   : > { %1273 = vmatmul.bf16.gmra.mxu2 %v1156_v2  ;;  %1291 = vmatmul.bf16.gmra.mxu3 %v1159_v9  ;;  %v1479_v56 = vsel %vm1473_vm4, %v1477_v51, %v1478_v52  ;;  %v4242_v2 = vld [vmem:[%s5569_s3 + $0x3a0] sm:$0xff]  ;;  %v4241_v9 = vld [vmem:[%s5569_s3 + $0x398] sm:$0xff] }
 0x140   : > { %v4222_v51 = vld [vmem:[%s5569_s3 + $0x300] sm:$0xff] }
 0x141   : > { %1987 = vmatpush.bf16.msra.mxu2 %v4193_v15  ;;  %2165 = vmatpush.bf16.msrb.mxu0 %v4207_v20  ;;  %v4226_v15 = vld [vmem:[%s5569_s3 + $0x320] sm:$0xff]  ;;  %v4248_v20 = vld [vmem:[%s5569_s3 + $0x3d0] sm:$0xff] }
 0x142   : > { %2005 = vmatpush.bf16.msra.mxu3 %v4201_v16  ;;  %2183 = vmatpush.bf16.msrb.mxu1 %v4215_v22  ;;  %v4240_v16 = vld [vmem:[%s5569_s3 + $0x390] sm:$0xff]  ;;  %v4225_v22 = vld [vmem:[%s5569_s3 + $0x318] sm:$0xff] }
 0x145   : > { %1988 = vmatpush.bf16.msra.mxu2 %v4192_v27  ;;  %2166 = vmatpush.bf16.msrb.mxu0 %v4206_v33  ;;  %v4247_v27 = vld [vmem:[%s5569_s3 + $0x3c8] sm:$0xff]  ;;  %v4232_v33 = vld [vmem:[%s5569_s3 + $0x350] sm:$0xff] }
 0x146   : > { %2006 = vmatpush.bf16.msra.mxu3 %v4200_v28  ;;  %2184 = vmatpush.bf16.msrb.mxu1 %v4214_v38  ;;  %v1850_v28 = vshrl.u32 %v5298_v10, 16  ;;  %v1878_v38 = vshll.u32 %v1848_v21, 16  ;;  %v4238_v10 = vld [vmem:[%s5569_s3 + $0x380] sm:$0xff]  ;;  %v2462_v21 = vshrl.u32 %v5294_v5, 16 }
 0x148   : > { %1779 = vmatmul.bf16.vlgmr.msra.gmra.mxu0 %v1667_v40  ;;  %1797 = vmatmul.bf16.vlgmr.msra.gmra.mxu1 %v1670_v41  ;;  %v1852_v40 = vrot.slane %v1850_v28, 3  ;;  %v2464_v30 = vrot.slane %v2462_v21, 2 }
 0x149   : > { %1989 = vmatpush.bf16.msra.mxu2 %v4191_v19  ;;  %2570 = vmatpush.bf16.msra.mxu0 %v4245_v43  ;;  %v2056_v19 = vpack.c.b16 %v5182_v61, %v5178_v57  ;;  %v4223_v43 = vld [vmem:[%s5569_s3 + $0x308] sm:$0xff]  ;;  %v1869_v57 = vrot.slane %v1867_v34, 3 }
 0x14a   : > { %2007 = vmatpush.bf16.msra.mxu3 %v4199_v39  ;;  %2588 = vmatpush.bf16.msra.mxu1 %v4253_v44  ;;  %v4246_v39 = vld [vmem:[%s5569_s3 + $0x3c0] sm:$0xff]  ;;  %v1872_v44 = vrot.slane %v1870_v35, 4 }
 0x14d   : > { %1990 = vmatpush.bf16.msra.mxu2 %v4190_v48  ;;  %2571 = vmatpush.bf16.msra.mxu0 %v4244_v6  ;;  %v1856_v48 = vor.u32 %v1855_v12, %v1852_v40  ;;  %v1873_v6 = vor.u32 %v1872_v44, %v1869_v57  ;;  %v2246_v12 = vunpack.c.h.b16 %v2201_v32  ;;  %v4263_v57 = vld [vmem:[%s5569_s3 + $0x448] sm:$0xff] }
 0x14e   : > { %2008 = vmatpush.bf16.msra.mxu3 %v4198_v50  ;;  %2589 = vmatpush.bf16.msra.mxu1 %v4252_v53 }
 0x14f   : > { %1588 = vmatmul.bf16.vlgmr.msrb.gmra.mxu2 %v1476_v54  ;;  %1606 = vmatmul.bf16.vlgmr.msrb.gmra.mxu3 %v1479_v56 }
 0x151   : > { %2358 = vmatpush.bf16.msrb.mxu2 %v4229_v8  ;;  %2572 = vmatpush.bf16.msra.mxu0 %v4243_v59  ;;  %v4261_v8 = vld [vmem:[%s5569_s3 + $0x438] sm:$0xff]  ;;  %v2198_v59 = vld [vmem:[#allocation2] sm:$0xcc] }
 0x152   : > { %2376 = vmatpush.bf16.msrb.mxu3 %v4237_v58  ;;  %2590 = vmatpush.bf16.msra.mxu1 %v4251_v62  ;;  %v4269_v58 = vld [vmem:[%s5569_s3 + $0x478] sm:$0xff]  ;;  %v4260_v62 = vld [vmem:[%s5569_s3 + $0x430] sm:$0xff] }
 0x155   : > { %2359 = vmatpush.bf16.msrb.mxu2 %v4228_v63  ;;  %2573 = vmatpush.bf16.msra.mxu0 %v4242_v2  ;;  %v4268_v63 = vld [vmem:[%s5569_s3 + $0x470] sm:$0xff]  ;;  %v2240_v2 = vunpack.c.h.b16 %v2198_v59 }
 0x156   : > { %2377 = vmatpush.bf16.msrb.mxu3 %v4236_v1  ;;  %2591 = vmatpush.bf16.msra.mxu1 %v4250_v3  ;;  %v2239_v1 = vunpack.c.l.b16 %v2198_v59  ;;  %v2057_v3 = vpack.c.b16 %v5269_v45, %v5269_v45 }
 0x158   : > { %1784 = vmatmul.bf16.gmra.mxu0 %v1666_v31  ;;  %1802 = vmatmul.bf16.gmra.mxu1 %v1669_v29  ;;  %v1858_v31 = vshrl.u32 %v1847_v17, 16  ;;  %v4224_v29 = vld [vmem:[%s5569_s3 + $0x310] sm:$0xff]  ;;  %v2448_v17 = vshll.u32 %v5288_v0, 16 }
 0x159   : > { %2360 = vmatpush.bf16.msrb.mxu2 %v4227_v4  ;;  %2574 = vmatpush.bf16.msra.mxu0 %v4241_v9  ;;  %v2058_v4 = vpack.c.b16 %v5274_v49, %v5274_v49  ;;  %v4267_v9 = vld [vmem:[%s5569_s3 + $0x468] sm:$0xff] }
 0x15a   : > { %2378 = vmatpush.bf16.msrb.mxu3 %v4235_v7  ;;  %2592 = vmatpush.bf16.msra.mxu1 %v4249_v13  ;;  %v1860_v41 = vrot.slane %v1858_v31, 3  ;;  %v4259_v7 = vld [vmem:[%s5569_s3 + $0x428] sm:$0xff]  ;;  %v2247_v13 = vpack.c.b16 %v5180_v60, %v2239_v1  ;;  %v2465_v60 = vshll.u32 %v5294_v5, 16  ;;  %v2450_v28 = vrot.slane %v2448_v17, 3 }
 0x15c   : > { %v1864_v50 = vor.u32 %v1863_v42, %v1860_v41  ;;  %v2467_v31 = vrot.slane %v2465_v60, 3 }
 0x15d   : > { %2361 = vmatpush.bf16.msrb.mxu2 %v4226_v15  ;;  %2575 = vmatpush.bf16.msra.mxu0 %v4240_v16  ;;  %v5507_v15 = vpack.c.b16 %v5182_v61, %v2240_v2  ;;  %v4266_v16 = vld [vmem:[%s5569_s3 + $0x460] sm:$0xff]  ;;  %v2437_v61 = vshrl.u32 %v2247_v13, 16 }
 0x15e   : > { %2379 = vmatpush.bf16.msrb.mxu3 %v4234_v11  ;;  %2593 = vmatpush.bf16.msra.mxu1 %v4248_v20  ;;  %v1865_v54 = vsel %vm5606_vm15, %v1856_v48, %v1864_v50  ;;  %v4258_v11 = vld [vmem:[%s5569_s3 + $0x420] sm:$0xff]  ;;  %v2445_v20 = vshrl.u32 %v5288_v0, 16  ;;  %v2468_v40 = vor.u32 %v2467_v31, %v2464_v30 }
 0x15f   : > { %1593 = vmatmul.bf16.gmra.mxu2 %v1475_v47  ;;  %1611 = vmatmul.bf16.gmra.mxu3 %v1478_v52  ;;  %v1880_v47 = vrot.slane %v1878_v38, 4  ;;  %v4230_v52 = vld [vmem:[%s5569_s3 + $0x340] sm:$0xff]  ;;  %v2439_v34 = vrot.slane %v2437_v61, 2 }
 0x161   : > { %2362 = vmatpush.bf16.msrb.mxu2 %v4225_v22  ;;  %2576 = vmatpush.bf16.msra.mxu0 %v4239_v25  ;;  %v1881_v53 = vor.u32 %v1880_v47, %v1877_v46  ;;  %v2440_v22 = vshll.u32 %v2247_v13, 16  ;;  %v2457_v25 = vshll.u32 %v5507_v15, 16  ;;  %v2250_v47 = vpack.c.b16 %v2246_v12, %v5274_v49 }
 0x162   : > { %2380 = vmatpush.bf16.msrb.mxu3 %v4233_v23  ;;  %2594 = vmatpush.bf16.msra.mxu1 %v4247_v27  ;;  %v2454_v23 = vshrl.u32 %v5507_v15, 16  ;;  %v2447_v27 = vrot.slane %v2445_v20, 2 }
 0x163   : > { %v1882_v56 = vsel %vm5607_vm9, %v1873_v6, %v1881_v53  ;;  %v2442_v35 = vrot.slane %v2440_v22, 3  ;;  %v2459_v38 = vrot.slane %v2457_v25, 3  ;;  %v2255_v6 = vrot.slane %v5507_v15, 2 }
 0x164   : > { %v2456_v37 = vrot.slane %v2454_v23, 2 }
 0x165   : > { %2363 = vmatpush.bf16.msrb.mxu2 %v4224_v29  ;;  %2577 = vmatpush.bf16.msra.mxu0 %v4238_v10  ;;  %v4257_v29 = vld [vmem:[%s5569_s3 + $0x418] sm:$0xff]  ;;  %v2245_v10 = vunpack.c.l.b16 %v2201_v32  ;;  %v2443_v41 = vor.u32 %v2442_v35, %v2439_v34 }
 0x166   : > { %2381 = vmatpush.bf16.msrb.mxu3 %v4232_v33  ;;  %2595 = vmatpush.bf16.msra.mxu1 %v4246_v39  ;;  %v4265_v33 = vld [vmem:[%s5569_s3 + $0x458] sm:$0xff]  ;;  %v2451_v39 = vor.u32 %v2450_v28, %v2447_v27  ;;  %v2460_v42 = vor.u32 %v2459_v38, %v2456_v37 }
 0x168   : > { %2167 = vmatmul.bf16.vlgmr.msrb.gmra.mxu0 %v2055_v26  ;;  %2185 = vmatmul.bf16.vlgmr.msrb.gmra.mxu1 %v2056_v19  ;;  %v4256_v26 = vld [vmem:[%s5569_s3 + $0x410] sm:$0xff]  ;;  %v2452_v44 = vsel %vm5608_vm11, %v2443_v41, %v2451_v39  ;;  %v2469_v46 = vsel %vm5609_vm12, %v2460_v42, %v2468_v40 }
 0x169   : > { %2364 = vmatpush.bf16.msrb.mxu2 %v4223_v43  ;;  %v4264_v19 = vld [vmem:[%s5569_s3 + $0x450] sm:$0xff]  ;;  %v2249_v43 = vpack.c.b16 %v2245_v10, %v5269_v45  ;;  %v4254_v45 = vld [vmem:[%s5569_s3 + $0x400] sm:$0xff] }
 0x16a   : > { %2382 = vmatpush.bf16.msrb.mxu3 %v4231_v55  ;;  %v4255_v55 = vld [vmem:[%s5569_s3 + $0x408] sm:$0xff] }
 0x16b   : > { %v2253_v48 = vrot.slane %v2249_v43, 2 }
 0x16d   : > { %2365 = vmatpush.bf16.msrb.mxu2 %v4222_v51  ;;  %v2256_v51 = vrot.slane %v2250_v47, 2 }
 0x16e   : > { %2383 = vmatpush.bf16.msrb.mxu3 %v4230_v52  ;;  %v2252_v52 = vrot.slane %v2247_v13, 2 }
 0x16f   : > { %1991 = vmatmul.bf16.vlgmr.msra.gmra.mxu2 %v1865_v54  ;;  %2009 = vmatmul.bf16.vlgmr.msra.gmra.mxu3 %v1882_v56  ;;  %v2257_v49 = vsel %vm2251_vm13, %v2255_v6, %v2256_v51 }
 0x171   : > { %2754 = vmatpush.bf16.msra.mxu2 %v4261_v8 }
 0x172   : > { %2772 = vmatpush.bf16.msra.mxu3 %v4269_v58 }
 0x175   : > { %2755 = vmatpush.bf16.msra.mxu2 %v4260_v62 }
 0x176   : > { %2773 = vmatpush.bf16.msra.mxu3 %v4268_v63 }
 0x178   : > { %2172 = vmatmul.bf16.gmra.mxu0 %v2057_v3  ;;  %2190 = vmatmul.bf16.gmra.mxu1 %v2058_v4 }
 0x179   : > { %2756 = vmatpush.bf16.msra.mxu2 %v4259_v7 }
 0x17a   : > { %2774 = vmatpush.bf16.msra.mxu3 %v4267_v9 }
 0x17d   : > { %2757 = vmatpush.bf16.msra.mxu2 %v4258_v11 }
 0x17e   : > { %2775 = vmatpush.bf16.msra.mxu3 %v4266_v16 }
 0x17f   : > { %1996 = vmatmul.bf16.gmra.mxu2 %v1864_v50  ;;  %2014 = vmatmul.bf16.gmra.mxu3 %v1881_v53  ;;  %v4262_v50 = vld [vmem:[%s5569_s3 + $0x440] sm:$0xff]  ;;  %v2254_v53 = vsel %vm2251_vm13, %v2252_v52, %v2253_v48 }
 0x181   : > { %2758 = vmatpush.bf16.msra.mxu2 %v4257_v29 }
 0x182   : > { %2776 = vmatpush.bf16.msra.mxu3 %v4265_v33 }
 0x185   : > { %2759 = vmatpush.bf16.msra.mxu2 %v4256_v26 }
 0x186   : > { %2777 = vmatpush.bf16.msra.mxu3 %v4264_v19 }
 0x188   : > { %2578 = vmatmul.bf16.vlgmr.msra.gmra.mxu0 %v2452_v44  ;;  %2596 = vmatmul.bf16.vlgmr.msra.gmra.mxu1 %v2469_v46 }
 0x189   : > { %2760 = vmatpush.bf16.msra.mxu2 %v4255_v55 }
 0x18a   : > { %2778 = vmatpush.bf16.msra.mxu3 %v4263_v57 }
 0x18d   : > { %2761 = vmatpush.bf16.msra.mxu2 %v4254_v45 }
 0x18e   : > { %2779 = vmatpush.bf16.msra.mxu3 %v4262_v50 }
 0x18f   : > { %2366 = vmatmul.bf16.vlgmr.msrb.gmra.mxu2 %v2254_v53  ;;  %2384 = vmatmul.bf16.vlgmr.msrb.gmra.mxu3 %v2257_v49 }
 0x198   : > { %2583 = vmatmul.bf16.gmra.mxu0 %v2451_v39  ;;  %2601 = vmatmul.bf16.gmra.mxu1 %v2468_v40 }
 0x19f   : > { %2371 = vmatmul.bf16.gmra.mxu2 %v2253_v48  ;;  %2389 = vmatmul.bf16.gmra.mxu3 %v2256_v51 }
 0x1a5   : > { %v1407_v54 = vpop.f32.mrf.mxu0  ;;  %v1425_v56 = vpop.f32.mrf.mxu1 }
 0x1ad   : > { %v1409_v8 = vpop.f32.mrf.mxu0  ;;  %v1427_v58 = vpop.f32.mrf.mxu1 }
 0x1af   : > { %2762 = vmatmul.bf16.vlgmr.msra.gmra.mxu2 %v5341_v36  ;;  %2780 = vmatmul.bf16.vlgmr.msra.gmra.mxu3 %v5349_v14 }
 0x1b2   : > { %v1269_v59 = vpop.f32.mrf.mxu2  ;;  %v1287_v62 = vpop.f32.mrf.mxu3 }
 0x1b3   : > { %v1288_v63 = vadd.f32 %v1287_v62, %v1269_v59 }
 0x1b5   : > { %v1412_v1 = vpop.f32.mrf.mxu0  ;;  %v1430_v2 = vpop.f32.mrf.mxu1  ;;  %v1408_v3 = vadd.f32 %v1407_v54, %v1288_v63 }
 0x1b7   : > { %v1426_v4 = vadd.f32 %v1425_v56, %v1408_v3 }
 0x1ba   : > { %v1271_v7 = vpop.f32.mrf.mxu2  ;;  %v1289_v9 = vpop.f32.mrf.mxu3 }
 0x1bb   : > { %v1290_v13 = vadd.f32 %v1289_v9, %v1271_v7 }
 0x1bd   : > { %v1414_v15 = vpop.f32.mrf.mxu0  ;;  %v1432_v11 = vpop.f32.mrf.mxu1  ;;  %v1410_v16 = vadd.f32 %v1409_v8, %v1290_v13 }
 0x1bf   : > { %2767 = vmatmul.bf16.gmra.mxu2 %v2649_v18  ;;  %2785 = vmatmul.bf16.gmra.mxu3 %v2652_v24  ;;  %v1428_v36 = vadd.f32 %v1427_v58, %v1410_v16 }
 0x1c2   : > { %v1274_v14 = vpop.f32.mrf.mxu2  ;;  %v1292_v20 = vpop.f32.mrf.mxu3 }
 0x1c3   : > { %v1293_v17 = vadd.f32 %v1292_v20, %v1274_v14 }
 0x1c5   : > { %v1780_v21 = vpop.f32.mrf.mxu0  ;;  %v1798_v60 = vpop.f32.mrf.mxu1  ;;  %v1413_v61 = vadd.f32 %v1412_v1, %v1293_v17 }
 0x1c6   : > { %v1799_v22 = vadd.f32 %v1798_v60, %v1780_v21 }
 0x1c7   : > { %v1431_v23 = vadd.f32 %v1430_v2, %v1413_v61 }
 0x1ca   : > { %v1276_v25 = vpop.f32.mrf.mxu2  ;;  %v1294_v27 = vpop.f32.mrf.mxu3 }
 0x1cd   : > { %v1782_v28 = vpop.f32.mrf.mxu0  ;;  %v1800_v30 = vpop.f32.mrf.mxu1 }
 0x1ce   : > { %v1801_v31 = vadd.f32 %v1800_v30, %v1782_v28 }
 0x1d2   : > { %v1589_v32 = vpop.f32.mrf.mxu2  ;;  %v1607_v0 = vpop.f32.mrf.mxu3 }
 0x1d3   : > { %v1608_v18 = vadd.f32 %v1607_v0, %v1589_v32 }
 0x1d5   : > { %v1785_v29 = vpop.f32.mrf.mxu0  ;;  %v1803_v5 = vpop.f32.mrf.mxu1  ;;  %v1616_v24 = vadd.f32 %v1608_v18, %v1426_v4 }
 0x1d6   : > { %v1804_v33 = vadd.f32 %v1803_v5, %v1785_v29 }
 0x1d7   : > { %v1807_v34 = vadd.f32 %v1799_v22, %v1616_v24 }
 0x1da   : > { %v1591_v35 = vpop.f32.mrf.mxu2  ;;  %v1609_v37 = vpop.f32.mrf.mxu3 }
 0x1db   : > { %v1610_v38 = vadd.f32 %v1609_v37, %v1591_v35 }
 0x1dd   : > { %v1787_v10 = vpop.f32.mrf.mxu0  ;;  %v1805_v26 = vpop.f32.mrf.mxu1  ;;  %v1617_v19 = vadd.f32 %v1610_v38, %v1428_v36  ;;  %v4281_v38 = vld [vmem:[%s5570_s4] ss:$0 sm:$0xff] }
 0x1df   : > { %v1808_v39 = vadd.f32 %v1801_v31, %v1617_v19 }
 0x1e2   : > { %v1594_v40 = vpop.f32.mrf.mxu2  ;;  %v1612_v12 = vpop.f32.mrf.mxu3 }
 0x1e3   : > { %v1613_v41 = vadd.f32 %v1612_v12, %v1594_v40 }
 0x1e5   : > { %v2168_v42 = vpop.f32.mrf.mxu0  ;;  %v2186_v43 = vpop.f32.mrf.mxu1  ;;  %v1618_v55 = vadd.f32 %v1613_v41, %v1431_v23 }
 0x1e6   : > { %v2187_v57 = vadd.f32 %v2186_v43, %v2168_v42 }
 0x1e7   : > { %v1809_v44 = vadd.f32 %v1804_v33, %v1618_v55 }
 0x1ea   : > { %v1596_v46 = vpop.f32.mrf.mxu2  ;;  %v1614_v47 = vpop.f32.mrf.mxu3 }
 0x1ed   : > { %v2170_v48 = vpop.f32.mrf.mxu0  ;;  %v2188_v45 = vpop.f32.mrf.mxu1 }
 0x1ee   : > { %v2189_v50 = vadd.f32 %v2188_v45, %v2170_v48 }
 0x1f2   : > { %v1992_v51 = vpop.f32.mrf.mxu2  ;;  %v2010_v52 = vpop.f32.mrf.mxu3 }
 0x1f3   : > { %v2011_v6 = vadd.f32 %v2010_v52, %v1992_v51 }
 0x1f5   : > { %v2173_v53 = vpop.f32.mrf.mxu0  ;;  %v2191_v49 = vpop.f32.mrf.mxu1  ;;  %v2019_v54 = vadd.f32 %v2011_v6, %v1807_v34 }
 0x1f6   : > { %v2192_v56 = vadd.f32 %v2191_v49, %v2173_v53 }
 0x1f7   : > { %v2195_v8 = vadd.f32 %v2187_v57, %v2019_v54 }
 0x1fa   : > { %v1994_v58 = vpop.f32.mrf.mxu2  ;;  %v2012_v59 = vpop.f32.mrf.mxu3 }
 0x1fb   : > { %v2013_v62 = vadd.f32 %v2012_v59, %v1994_v58 }
 0x1fd   : > { %v2175_v63 = vpop.f32.mrf.mxu0  ;;  %v2193_v1 = vpop.f32.mrf.mxu1  ;;  %v2020_v2 = vadd.f32 %v2013_v62, %v1808_v39 }
 0x1ff   : > { %v2196_v3 = vadd.f32 %v2189_v50, %v2020_v2 }
 0x202   : > { %v1997_v4 = vpop.f32.mrf.mxu2  ;;  %v2015_v7 = vpop.f32.mrf.mxu3 }
 0x203   : > { %v2016_v9 = vadd.f32 %v2015_v7, %v1997_v4 }
 0x205   : > { %v2579_v13 = vpop.f32.mrf.mxu0  ;;  %v2597_v15 = vpop.f32.mrf.mxu1  ;;  %v2021_v11 = vadd.f32 %v2016_v9, %v1809_v44 }
 0x206   : > { %v2598_v5 = vadd.f32 %v2597_v15, %v2579_v13 }
 0x207   : > { %v2197_v16 = vadd.f32 %v2192_v56, %v2021_v11 }
 0x20a   : > { %v1999_v36 = vpop.f32.mrf.mxu2  ;;  %v2017_v14 = vpop.f32.mrf.mxu3 }
 0x20d   : > { %v2581_v20 = vpop.f32.mrf.mxu0  ;;  %v2599_v17 = vpop.f32.mrf.mxu1 }
 0x20e   : > { %v2600_v39 = vadd.f32 %v2599_v17, %v2581_v20 }
 0x212   : > { %v2367_v21 = vpop.f32.mrf.mxu2  ;;  %v2385_v60 = vpop.f32.mrf.mxu3 }
 0x213   : > { %v2386_v18 = vadd.f32 %v2385_v60, %v2367_v21 }
 0x215   : > { %v2584_v61 = vpop.f32.mrf.mxu0  ;;  %v2602_v22 = vpop.f32.mrf.mxu1  ;;  %v2394_v29 = vadd.f32 %v2386_v18, %v2195_v8 }
 0x216   : > { %v2603_v46 = vadd.f32 %v2602_v22, %v2584_v61 }
 0x217   : > { %v2606_v35 = vadd.f32 %v2598_v5, %v2394_v29 }
 0x21a   : > { %v2369_v23 = vpop.f32.mrf.mxu2  ;;  %v2387_v25 = vpop.f32.mrf.mxu3 }
 0x21b   : > { %v2388_v34 = vadd.f32 %v2387_v25, %v2369_v23 }
 0x21d   : > { %v2586_v27 = vpop.f32.mrf.mxu0  ;;  %v2604_v28 = vpop.f32.mrf.mxu1  ;;  %v2395_v26 = vadd.f32 %v2388_v34, %v2196_v3 }
 0x21f   : > { %v2607_v42 = vadd.f32 %v2600_v39, %v2395_v26 }
 0x222   : > { %v2372_v30 = vpop.f32.mrf.mxu2  ;;  %v2390_v31 = vpop.f32.mrf.mxu3 }
 0x223   : > { %v2391_v41 = vadd.f32 %v2390_v31, %v2372_v30 }
 0x225   : > { %v2396_v57 = vadd.f32 %v2391_v41, %v2197_v16 }
 0x227   : > { %v2608_v45 = vadd.f32 %v2603_v46, %v2396_v57 }
 0x22a   : > { %v2374_v32 = vpop.f32.mrf.mxu2  ;;  %v2392_v0 = vpop.f32.mrf.mxu3 }
 0x232   : > { %v2763_v24 = vpop.f32.mrf.mxu2  ;;  %v2781_v33 = vpop.f32.mrf.mxu3 }
 0x233   : > { %v2782_v37 = vadd.f32 %v2781_v33, %v2763_v24 }
 0x235   : > { %v2790_v10 = vadd.f32 %v2782_v37, %v2606_v35 }
 0x237   : > { %v2797_v19 = vadd.f32 %v4281_v38, %v2790_v10 }
 0x239   : > { %2800 = vst [vmem:[%s224_s24] sm:$0xff] %v2797_v19 }
 0x23a   : > { %v2765_v40 = vpop.f32.mrf.mxu2  ;;  %v2783_v12 = vpop.f32.mrf.mxu3 }
 0x23b   : > { %v2784_v43 = vadd.f32 %v2783_v12, %v2765_v40 }
 0x23d   : > { %v2791_v55 = vadd.f32 %v2784_v43, %v2607_v42 }
 0x23f   : > { %v2798_v44 = vadd.f32 %v4281_v38, %v2791_v55 }
 0x241   : > { %2801 = vst [vmem:[%s224_s24 + $0x8] sm:$0xff] %v2798_v44 }
 0x242   : > { %v2768_v47 = vpop.f32.mrf.mxu2  ;;  %v2786_v48 = vpop.f32.mrf.mxu3 }
 0x243   : > { %v2787_v50 = vadd.f32 %v2786_v48, %v2768_v47 }
 0x245   : > { %v2792_v51 = vadd.f32 %v2787_v50, %v2608_v45 }
 0x247   : > { %v2799_v52 = vadd.f32 %v4281_v38, %v2792_v51 }
 0x249   : > { %2802 = vst [vmem:[%s224_s24 + $0x10] sm:$0xff] %v2799_v52 }
 0x24a   : > { %v2770_v6 = vpop.f32.mrf.mxu2  ;;  %v2788_v53 = vpop.f32.mrf.mxu3 }
 0x24b PF: > { %s15_s18 = sadd.s32 1, %s4288_s18  }
 0x24c   : > { %p12_p4 = scmp.ge.s32.totalorder %s15_s18, 4  }
 0x24e   :  { %14 = sbr.rel (!%p12_p4) target bundleno = 1 (0x1), region = 80 }

</bundles_post_ra>
